<compile_context>
chip_gen: v7x
topology: tpu7x:2x2x1
jax: 0.10.0
libtpu: 0.0.40
codegen_flags: <defaults>
</compile_context>

<pallas_src>
import jax
import jax.numpy as jnp
from jax import lax
from jax.experimental import pallas as pl
from jax.experimental.pallas import tpu as pltpu

HIDDEN = 64
EMB = 64
INPUT = 1

TIME_CHUNK_MAX = 512   # timesteps pipelined per grid step (input block = TT*BB*4 B)
BATCH_BLOCK_MAX = 32   # f32 batch rows per program (raise only with bf16 operands)


def _make_kernel(H, T, TT, nt, BB):
    H4 = 4 * H

    def cell(gates, c_prev):
        # PyTorch gate order: i, f, g, o.  Sigmoid at full (BB, 4H) width,
        # tanh only on the g slice (don't waste EUP pushes on the critical path).
        sig = jax.nn.sigmoid(gates)
        i = sig[:, 0 * H:1 * H]
        f = sig[:, 1 * H:2 * H]
        o = sig[:, 3 * H:4 * H]
        g = jnp.tanh(gates[:, 2 * H:3 * H])
        c_new = f * c_prev + i * g
        h_new = o * jnp.tanh(c_new)
        return h_new, c_new

    # Co-tune unroll with batch-block size (vreg pressure: ~BB*3 KiB live per
    # in-flight step against 64 x 4 KiB vregs).
    if BB <= 8:
        max_unroll = 8
    elif BB <= 16:
        max_unroll = 4
    else:
        max_unroll = 2

    def pick_unroll(nsteps):
        if nsteps <= 32 and BB <= 8:
            return True
        for u in (max_unroll, 4, 2):
            if u <= max_unroll and nsteps % u == 0:
                return u
        return 1

    def kernel(x_ref,      # (TT, BB, 1)  raw input chunk
               wih0_ref,   # (1, 4H)      layer-0 input weights (input_size==1)
               b0_ref,     # (1, 4H)      layer-0 combined bias
               whh0_ref,   # (H, 4H)      layer-0 recurrent weights (transposed)
               w1_ref,     # (2H, 4H)     layer-1 [W_ih; W_hh] stacked (transposed)
               b1_ref,     # (1, 4H)      layer-1 combined bias
               wfc_h_ref,  # (1, H)       FC weights for the hidden half
               embt_ref,   # (BB, 1)      precomputed x_emb @ Wfc_e^T + b_fc
               out_ref,    # (BB, 1)
               h0_s, c0_s, h1_s, c1_s):   # VMEM (BB, H) state carries
        t_idx = pl.program_id(1)

        @pl.when(t_idx == 0)
        def _():
            z = jnp.zeros((BB, H), jnp.float32)
            h0_s[...] = z
            c0_s[...] = z
            h1_s[...] = z
            c1_s[...] = z

        # Hoist constant broadcasts out of the recurrence (not CSE'd otherwise).
        wih0_bb = jnp.broadcast_to(wih0_ref[...], (BB, H4))
        b0_bb = jnp.broadcast_to(b0_ref[...], (BB, H4))
        b1_bb = jnp.broadcast_to(b1_ref[...], (BB, H4))

        def step(t, carry):
            h0, c0, h1, c1 = carry
            xt = x_ref[t]                              # (BB, 1) raw input scalar/row
            # layer 0: broadcast input projection + one recurrent matmul
            g0 = (xt * wih0_bb + b0_bb
                  + jnp.dot(h0, whh0_ref[...],
                            preferred_element_type=jnp.float32))
            h0n, c0n = cell(g0, c0)
            # layer 1: single fused (BB, 2H) @ (2H, 4H) matmul
            h01 = jnp.concatenate([h0n, h1], axis=-1)
            g1 = jnp.dot(h01, w1_ref[...],
                         preferred_element_type=jnp.float32) + b1_bb
            h1n, c1n = cell(g1, c1)
            return h0n, c0n, h1n, c1n

        def run(nsteps):
            carry0 = (h0_s[...], c0_s[...], h1_s[...], c1_s[...])
            h0, c0, h1, c1 = lax.fori_loop(0, nsteps, step, carry0,
                                           unroll=pick_unroll(nsteps))
            h0_s[...] = h0
            c0_s[...] = c0
            h1_s[...] = h1
            c1_s[...] = c1

        rem = T - (nt - 1) * TT   # static: valid steps in the final chunk
        if rem == TT:
            run(TT)               # no time padding: uniform, branch-free
        else:
            @pl.when(t_idx < nt - 1)
            def _():
                run(TT)

            @pl.when(t_idx == nt - 1)
            def _():
                run(rem)          # static trip count -> no per-step masking

        @pl.when(t_idx == nt - 1)
        def _():
            h1f = h1_s[...]
            out_ref[...] = (jnp.sum(h1f * wfc_h_ref[...], axis=-1,
                                    keepdims=True)
                            + embt_ref[...])

    return kernel


def lstm_with_embedding(x_seq, x_emb, params, *, time_chunk=None):
    """x_seq: (B, T, 1) f32, x_emb: (B, E) f32 -> (B, 1) f32."""
    (wih0, whh0, bih0, bhh0,
     wih1, whh1, bih1, bhh1,
     wfc, bfc) = params
    B, T, I = x_seq.shape
    assert I == 1, "input_size must be 1 for the broadcast input projection"
    H = whh0.shape[1]
    E = x_emb.shape[1]
    H4 = 4 * H
    f32 = jnp.float32

    # Batch tiling: up to BATCH_BLOCK_MAX rows per program (keeps nb >= 2 for
    # megacore sharding on v7x once B is large; single wide block otherwise).
    BB = min(((B + 7) // 8) * 8, BATCH_BLOCK_MAX)
    nb = pl.cdiv(B, BB)
    B_pad = nb * BB

    # Time chunking: the input block is only TT*BB*4 bytes, so large chunks are cheap.
    tc = TIME_CHUNK_MAX if time_chunk is None else time_chunk
    TT = min(T, tc)
    nt = pl.cdiv(T, TT)
    T_pad = nt * TT

    # Stream raw x: (B, T, 1) -> (T_pad, B_pad, 1).  Tiny (4 B/step/row).
    x_tb = jnp.transpose(x_seq.astype(f32), (1, 0, 2))
    x_tb = jnp.pad(x_tb, ((0, T_pad - T), (0, B_pad - B), (0, 0)))

    wih0_row = wih0.astype(f32).reshape(1, H4)
    b0 = (bih0 + bhh0).astype(f32).reshape(1, H4)
    whh0_t = whh0.astype(f32).T                                        # (H, 4H)
    w1 = jnp.concatenate([wih1.astype(f32).T, whh1.astype(f32).T], 0)  # (2H, 4H)
    b1 = (bih1 + bhh1).astype(f32).reshape(1, H4)

    # FC split: embedding half (LSTM-independent) precomputed by XLA.
    wfc_f = wfc.astype(f32)
    wfc_h = wfc_f[:, :H].reshape(1, H)
    emb_term = x_emb.astype(f32) @ wfc_f[:, H:].T + bfc.astype(f32).reshape(1, 1)
    emb_term = jnp.pad(emb_term, ((0, B_pad - B), (0, 0)))             # (B_pad, 1)

    kernel = _make_kernel(H, T, TT, nt, BB)

    grid_spec = pltpu.PrefetchScalarGridSpec(
        num_scalar_prefetch=0,
        grid=(nb, nt),
        in_specs=[
            pl.BlockSpec((TT, BB, 1), lambda b, t: (t, b, 0)),
            pl.BlockSpec((1, H4), lambda b, t: (0, 0)),
            pl.BlockSpec((1, H4), lambda b, t: (0, 0)),
            pl.BlockSpec((H, H4), lambda b, t: (0, 0)),
            pl.BlockSpec((2 * H, H4), lambda b, t: (0, 0)),
            pl.BlockSpec((1, H4), lambda b, t: (0, 0)),
            pl.BlockSpec((1, H), lambda b, t: (0, 0)),
            pl.BlockSpec((BB, 1), lambda b, t: (b, 0)),
        ],
        out_specs=pl.BlockSpec((BB, 1), lambda b, t: (b, 0)),
        scratch_shapes=[pltpu.VMEM((BB, H), f32)] * 4,
    )

    out = pl.pallas_call(
        kernel,
        out_shape=jax.ShapeDtypeStruct((B_pad, 1), f32),
        grid_spec=grid_spec,
        compiler_params=pltpu.CompilerParams(
            dimension_semantics=("parallel", "arbitrary")),
    )(x_tb, wih0_row, b0, whh0_t, w1, b1, wfc_h, emb_term)
    return out[:B]


def init_params(key, hidden=HIDDEN, emb=EMB, input_size=INPUT):
    """Deterministic init matching PyTorch parameter shapes."""
    k = jax.random.split(key, 10)
    bound = 1.0 / jnp.sqrt(hidden)
    u = lambda kk, shape: jax.random.uniform(kk, shape, jnp.float32, -bound, bound)
    wih0 = u(k[0], (4 * hidden, input_size))
    whh0 = u(k[1], (4 * hidden, hidden))
    bih0 = u(k[2], (4 * hidden,))
    bhh0 = u(k[3], (4 * hidden,))
    wih1 = u(k[4], (4 * hidden, hidden))
    whh1 = u(k[5], (4 * hidden, hidden))
    bih1 = u(k[6], (4 * hidden,))
    bhh1 = u(k[7], (4 * hidden,))
    wfc = u(k[8], (1, hidden + emb))
    bfc = u(k[9], (1,))
    return (wih0, whh0, bih0, bhh0, wih1, whh1, bih1, bhh1, wfc, bfc)


def reference_forward(x_seq, x_emb, params):
    """Pure-JAX reference of the PyTorch forward (for verification)."""
    (wih0, whh0, bih0, bhh0,
     wih1, whh1, bih1, bhh1,
     wfc, bfc) = params
    B, T, _ = x_seq.shape
    H = whh0.shape[1]
    h0 = c0 = h1 = c1 = jnp.zeros((B, H), jnp.float32)

    def cell(g, c_prev):
        i = jax.nn.sigmoid(g[:, 0 * H:1 * H])
        f = jax.nn.sigmoid(g[:, 1 * H:2 * H])
        gg = jnp.tanh(g[:, 2 * H:3 * H])
        o = jax.nn.sigmoid(g[:, 3 * H:4 * H])
        c = f * c_prev + i * gg
        return o * jnp.tanh(c), c

    for t in range(T):
        xt = x_seq[:, t, :]
        g0 = xt @ wih0.T + h0 @ whh0.T + bih0 + bhh0
        h0, c0 = cell(g0, c0)
        g1 = h0 @ wih1.T + h1 @ whh1.T + bih1 + bhh1
        h1, c1 = cell(g1, c1)

    combined = jnp.concatenate([h1, x_emb], axis=-1)
    return combined @ wfc.T + bfc


if __name__ == "__main__":
    key = jax.random.PRNGKey(0)
    kp, kx, ke, kx2, ke2, kx3, ke3 = jax.random.split(key, 7)

    params = init_params(kp)

    # Case 1: batch aligned to a single batch block, single time chunk.
    B, T = 8, 8
    x_seq = jax.random.normal(kx, (B, T, INPUT), jnp.float32)
    x_emb = jax.random.normal(ke, (B, EMB), jnp.float32)
    out = jax.block_until_ready(lstm_with_embedding(x_seq, x_emb, params))
    ref = reference_forward(x_seq, x_emb, params)
    assert out.shape == (B, 1)
    assert jnp.allclose(out, ref, atol=1e-4, rtol=1e-4), (out, ref)

    # Case 2: ragged batch (exercises batch padding).
    B2, T2 = 3, 5
    x_seq2 = jax.random.normal(kx2, (B2, T2, INPUT), jnp.float32)
    x_emb2 = jax.random.normal(ke2, (B2, EMB), jnp.float32)
    out2 = jax.block_until_ready(lstm_with_embedding(x_seq2, x_emb2, params))
    ref2 = reference_forward(x_seq2, x_emb2, params)
    assert out2.shape == (B2, 1)
    assert jnp.allclose(out2, ref2, atol=1e-4, rtol=1e-4), (out2, ref2)

    # Case 3: multiple batch blocks + multiple time chunks with a ragged tail
    # (exercises the static-remainder path and the grid over both axes).
    B3, T3 = 40, 11
    x_seq3 = jax.random.normal(kx3, (B3, T3, INPUT), jnp.float32)
    x_emb3 = jax.random.normal(ke3, (B3, EMB), jnp.float32)
    out3 = jax.block_until_ready(
        lstm_with_embedding(x_seq3, x_emb3, params, time_chunk=4))
    ref3 = reference_forward(x_seq3, x_emb3, params)
    assert out3.shape == (B3, 1)
    assert jnp.allclose(out3, ref3, atol=1e-4, rtol=1e-4), (out3, ref3)

    print("KERNEL_OK")
</pallas_src>

<mosaic_0001>
module attributes {stable_mosaic.version = 11 : i64} {
  func.func @kernel(%arg0: i32, %arg1: i32, %arg2: memref<8x8x1xf32, #tpu.memory_space<vmem>>, %arg3: memref<1x256xf32, #tpu.memory_space<vmem>>, %arg4: memref<1x256xf32, #tpu.memory_space<vmem>>, %arg5: memref<64x256xf32, #tpu.memory_space<vmem>>, %arg6: memref<128x256xf32, #tpu.memory_space<vmem>>, %arg7: memref<1x256xf32, #tpu.memory_space<vmem>>, %arg8: memref<1x64xf32, #tpu.memory_space<vmem>>, %arg9: memref<8x1xf32, #tpu.memory_space<vmem>>, %arg10: memref<8x1xf32, #tpu.memory_space<vmem>>, %arg11: memref<8x64xf32, #tpu.memory_space<vmem>>, %arg12: memref<8x64xf32, #tpu.memory_space<vmem>>, %arg13: memref<8x64xf32, #tpu.memory_space<vmem>>, %arg14: memref<8x64xf32, #tpu.memory_space<vmem>>) attributes {dimension_semantics = [#tpu.dimension_semantics<parallel>, #tpu.dimension_semantics<arbitrary>], iteration_bounds = array<i64: 1, 1>, scalar_prefetch = 0 : i64, scratch_operands = 4 : i64, tpu.core_type = #tpu.core_type<tc>, window_params = [{transform_indices = @transform_0, window_bounds = array<i64: 8, 8, 1>}, {pipeline_mode = #tpu.pipeline_mode<synchronous>, transform_indices = @transform_1, window_bounds = array<i64: 1, 256>}, {pipeline_mode = #tpu.pipeline_mode<synchronous>, transform_indices = @transform_2, window_bounds = array<i64: 1, 256>}, {pipeline_mode = #tpu.pipeline_mode<synchronous>, transform_indices = @transform_3, window_bounds = array<i64: 64, 256>}, {pipeline_mode = #tpu.pipeline_mode<synchronous>, transform_indices = @transform_4, window_bounds = array<i64: 128, 256>}, {pipeline_mode = #tpu.pipeline_mode<synchronous>, transform_indices = @transform_5, window_bounds = array<i64: 1, 256>}, {pipeline_mode = #tpu.pipeline_mode<synchronous>, transform_indices = @transform_6, window_bounds = array<i64: 1, 64>}, {transform_indices = @transform_7, window_bounds = array<i64: 8, 1>}, {transform_indices = @transform_8, window_bounds = array<i64: 8, 1>}]} {
    %c0_i32 = arith.constant 0 : i32
    %0 = arith.cmpi eq, %arg1, %c0_i32 : i32
    %1 = arith.extui %0 : i1 to i32
    %c0_i32_0 = arith.constant 0 : i32
    %2 = arith.cmpi ne, %1, %c0_i32_0 : i32
    scf.if %2 {
      %cst_104 = arith.constant 0.000000e+00 : f32
      %367 = vector.broadcast %cst_104 : f32 to vector<8x64xf32>
      %c0_105 = arith.constant 0 : index
      %c0_106 = arith.constant 0 : index
      %368 = vector.load %arg11[%c0_105, %c0_106] : memref<8x64xf32, #tpu.memory_space<vmem>>, vector<8x64xf32>
      tpu.vector_store %arg11[%c0_105, %c0_106], %367 {strides = array<i32>} : memref<8x64xf32, #tpu.memory_space<vmem>>, vector<8x64xf32>,
      %c0_107 = arith.constant 0 : index
      %c0_108 = arith.constant 0 : index
      %369 = vector.load %arg12[%c0_107, %c0_108] : memref<8x64xf32, #tpu.memory_space<vmem>>, vector<8x64xf32>
      tpu.vector_store %arg12[%c0_107, %c0_108], %367 {strides = array<i32>} : memref<8x64xf32, #tpu.memory_space<vmem>>, vector<8x64xf32>,
      %c0_109 = arith.constant 0 : index
      %c0_110 = arith.constant 0 : index
      %370 = vector.load %arg13[%c0_109, %c0_110] : memref<8x64xf32, #tpu.memory_space<vmem>>, vector<8x64xf32>
      tpu.vector_store %arg13[%c0_109, %c0_110], %367 {strides = array<i32>} : memref<8x64xf32, #tpu.memory_space<vmem>>, vector<8x64xf32>,
      %c0_111 = arith.constant 0 : index
      %c0_112 = arith.constant 0 : index
      %371 = vector.load %arg14[%c0_111, %c0_112] : memref<8x64xf32, #tpu.memory_space<vmem>>, vector<8x64xf32>
      tpu.vector_store %arg14[%c0_111, %c0_112], %367 {strides = array<i32>} : memref<8x64xf32, #tpu.memory_space<vmem>>, vector<8x64xf32>,
    } else {
    }
    %c0 = arith.constant 0 : index
    %c0_1 = arith.constant 0 : index
    %3 = vector.load %arg3[%c0, %c0_1] : memref<1x256xf32, #tpu.memory_space<vmem>>, vector<1x256xf32>
    %4 = vector.shape_cast %3 : vector<1x256xf32> to vector<1x256xf32>
    %5 = vector.broadcast %4 : vector<1x256xf32> to vector<8x256xf32>
    %c0_2 = arith.constant 0 : index
    %c0_3 = arith.constant 0 : index
    %6 = vector.load %arg4[%c0_2, %c0_3] : memref<1x256xf32, #tpu.memory_space<vmem>>, vector<1x256xf32>
    %7 = vector.shape_cast %6 : vector<1x256xf32> to vector<1x256xf32>
    %8 = vector.broadcast %7 : vector<1x256xf32> to vector<8x256xf32>
    %c0_4 = arith.constant 0 : index
    %c0_5 = arith.constant 0 : index
    %9 = vector.load %arg7[%c0_4, %c0_5] : memref<1x256xf32, #tpu.memory_space<vmem>>, vector<1x256xf32>
    %10 = vector.shape_cast %9 : vector<1x256xf32> to vector<1x256xf32>
    %11 = vector.broadcast %10 : vector<1x256xf32> to vector<8x256xf32>
    %c0_6 = arith.constant 0 : index
    %c0_7 = arith.constant 0 : index
    %12 = vector.load %arg11[%c0_6, %c0_7] : memref<8x64xf32, #tpu.memory_space<vmem>>, vector<8x64xf32>
    %c0_8 = arith.constant 0 : index
    %c0_9 = arith.constant 0 : index
    %13 = vector.load %arg12[%c0_8, %c0_9] : memref<8x64xf32, #tpu.memory_space<vmem>>, vector<8x64xf32>
    %c0_10 = arith.constant 0 : index
    %c0_11 = arith.constant 0 : index
    %14 = vector.load %arg13[%c0_10, %c0_11] : memref<8x64xf32, #tpu.memory_space<vmem>>, vector<8x64xf32>
    %c0_12 = arith.constant 0 : index
    %c0_13 = arith.constant 0 : index
    %15 = vector.load %arg14[%c0_12, %c0_13] : memref<8x64xf32, #tpu.memory_space<vmem>>, vector<8x64xf32>
    %c0_i32_14 = arith.constant 0 : i32
    %16 = arith.index_cast %c0_i32_14 : i32 to index
    %c0_15 = arith.constant 0 : index
    %c0_16 = arith.constant 0 : index
    %17 = vector.load %arg2[%16, %c0_15, %c0_16] : memref<8x8x1xf32, #tpu.memory_space<vmem>>, vector<1x8x1xf32>
    %18 = vector.shape_cast %17 : vector<1x8x1xf32> to vector<8x1xf32>
    %19 = vector.broadcast %18 : vector<8x1xf32> to vector<8x256xf32>
    %20 = arith.mulf %19, %5 : vector<8x256xf32>
    %21 = arith.addf %20, %8 : vector<8x256xf32>
    %c0_17 = arith.constant 0 : index
    %c0_18 = arith.constant 0 : index
    %22 = vector.load %arg5[%c0_17, %c0_18] : memref<64x256xf32, #tpu.memory_space<vmem>>, vector<64x256xf32>
    %cst = arith.constant dense<0.000000e+00> : vector<8x256xf32>
    %23 = tpu.matmul %12, %22, %cst {dimension_numbers = #tpu.dot_dimension_numbers<[1], [0], [0], [1], [0, 0, 1, 1], [], []>} : vector<8x64xf32>, vector<64x256xf32>, vector<8x256xf32> -> vector<8x256xf32>
    %24 = arith.addf %21, %23 : vector<8x256xf32>
    %25 = arith.negf %24 : vector<8x256xf32>
    %26 = math.exp %25 : vector<8x256xf32>
    %cst_19 = arith.constant 1.000000e+00 : f32
    %27 = vector.broadcast %cst_19 : f32 to vector<8x256xf32>
    %28 = arith.addf %27, %26 : vector<8x256xf32>
    %29 = arith.divf %27, %28 : vector<8x256xf32>
    %30 = vector.extract_strided_slice %29 {offsets = [0, 0], sizes = [8, 64], strides = [1, 1]} : vector<8x256xf32> to vector<8x64xf32>
    %31 = vector.extract_strided_slice %29 {offsets = [0, 64], sizes = [8, 64], strides = [1, 1]} : vector<8x256xf32> to vector<8x64xf32>
    %32 = vector.extract_strided_slice %29 {offsets = [0, 192], sizes = [8, 64], strides = [1, 1]} : vector<8x256xf32> to vector<8x64xf32>
    %33 = vector.extract_strided_slice %24 {offsets = [0, 128], sizes = [8, 64], strides = [1, 1]} : vector<8x256xf32> to vector<8x64xf32>
    %34 = math.tanh %33 : vector<8x64xf32>
    %35 = arith.mulf %31, %13 : vector<8x64xf32>
    %36 = arith.mulf %30, %34 : vector<8x64xf32>
    %37 = arith.addf %35, %36 : vector<8x64xf32>
    %38 = math.tanh %37 : vector<8x64xf32>
    %39 = arith.mulf %32, %38 : vector<8x64xf32>
    %40 = tpu.concatenate %39, %14 in 1 : vector<8x64xf32>, vector<8x64xf32> -> vector<8x128xf32>
    %c0_20 = arith.constant 0 : index
    %c0_21 = arith.constant 0 : index
    %41 = vector.load %arg6[%c0_20, %c0_21] : memref<128x256xf32, #tpu.memory_space<vmem>>, vector<128x256xf32>
    %cst_22 = arith.constant dense<0.000000e+00> : vector<8x256xf32>
    %42 = tpu.matmul %40, %41, %cst_22 {dimension_numbers = #tpu.dot_dimension_numbers<[1], [0], [0], [1], [0, 0, 1, 1], [], []>} : vector<8x128xf32>, vector<128x256xf32>, vector<8x256xf32> -> vector<8x256xf32>
    %43 = arith.addf %42, %11 : vector<8x256xf32>
    %44 = arith.negf %43 : vector<8x256xf32>
    %45 = math.exp %44 : vector<8x256xf32>
    %cst_23 = arith.constant 1.000000e+00 : f32
    %46 = vector.broadcast %cst_23 : f32 to vector<8x256xf32>
    %47 = arith.addf %46, %45 : vector<8x256xf32>
    %48 = arith.divf %46, %47 : vector<8x256xf32>
    %49 = vector.extract_strided_slice %48 {offsets = [0, 0], sizes = [8, 64], strides = [1, 1]} : vector<8x256xf32> to vector<8x64xf32>
    %50 = vector.extract_strided_slice %48 {offsets = [0, 64], sizes = [8, 64], strides = [1, 1]} : vector<8x256xf32> to vector<8x64xf32>
    %51 = vector.extract_strided_slice %48 {offsets = [0, 192], sizes = [8, 64], strides = [1, 1]} : vector<8x256xf32> to vector<8x64xf32>
    %52 = vector.extract_strided_slice %43 {offsets = [0, 128], sizes = [8, 64], strides = [1, 1]} : vector<8x256xf32> to vector<8x64xf32>
    %53 = math.tanh %52 : vector<8x64xf32>
    %54 = arith.mulf %50, %15 : vector<8x64xf32>
    %55 = arith.mulf %49, %53 : vector<8x64xf32>
    %56 = arith.addf %54, %55 : vector<8x64xf32>
    %57 = math.tanh %56 : vector<8x64xf32>
    %58 = arith.mulf %51, %57 : vector<8x64xf32>
    %c1_i32 = arith.constant 1 : i32
    %59 = arith.index_cast %c1_i32 : i32 to index
    %c0_24 = arith.constant 0 : index
    %c0_25 = arith.constant 0 : index
    %60 = vector.load %arg2[%59, %c0_24, %c0_25] : memref<8x8x1xf32, #tpu.memory_space<vmem>>, vector<1x8x1xf32>
    %61 = vector.shape_cast %60 : vector<1x8x1xf32> to vector<8x1xf32>
    %62 = vector.broadcast %61 : vector<8x1xf32> to vector<8x256xf32>
    %63 = arith.mulf %62, %5 : vector<8x256xf32>
    %64 = arith.addf %63, %8 : vector<8x256xf32>
    %c0_26 = arith.constant 0 : index
    %c0_27 = arith.constant 0 : index
    %65 = vector.load %arg5[%c0_26, %c0_27] : memref<64x256xf32, #tpu.memory_space<vmem>>, vector<64x256xf32>
    %cst_28 = arith.constant dense<0.000000e+00> : vector<8x256xf32>
    %66 = tpu.matmul %39, %65, %cst_28 {dimension_numbers = #tpu.dot_dimension_numbers<[1], [0], [0], [1], [0, 0, 1, 1], [], []>} : vector<8x64xf32>, vector<64x256xf32>, vector<8x256xf32> -> vector<8x256xf32>
    %67 = arith.addf %64, %66 : vector<8x256xf32>
    %68 = arith.negf %67 : vector<8x256xf32>
    %69 = math.exp %68 : vector<8x256xf32>
    %cst_29 = arith.constant 1.000000e+00 : f32
    %70 = vector.broadcast %cst_29 : f32 to vector<8x256xf32>
    %71 = arith.addf %70, %69 : vector<8x256xf32>
    %72 = arith.divf %70, %71 : vector<8x256xf32>
    %73 = vector.extract_strided_slice %72 {offsets = [0, 0], sizes = [8, 64], strides = [1, 1]} : vector<8x256xf32> to vector<8x64xf32>
    %74 = vector.extract_strided_slice %72 {offsets = [0, 64], sizes = [8, 64], strides = [1, 1]} : vector<8x256xf32> to vector<8x64xf32>
    %75 = vector.extract_strided_slice %72 {offsets = [0, 192], sizes = [8, 64], strides = [1, 1]} : vector<8x256xf32> to vector<8x64xf32>
    %76 = vector.extract_strided_slice %67 {offsets = [0, 128], sizes = [8, 64], strides = [1, 1]} : vector<8x256xf32> to vector<8x64xf32>
    %77 = math.tanh %76 : vector<8x64xf32>
    %78 = arith.mulf %74, %37 : vector<8x64xf32>
    %79 = arith.mulf %73, %77 : vector<8x64xf32>
    %80 = arith.addf %78, %79 : vector<8x64xf32>
    %81 = math.tanh %80 : vector<8x64xf32>
    %82 = arith.mulf %75, %81 : vector<8x64xf32>
    %83 = tpu.concatenate %82, %58 in 1 : vector<8x64xf32>, vector<8x64xf32> -> vector<8x128xf32>
    %c0_30 = arith.constant 0 : index
    %c0_31 = arith.constant 0 : index
    %84 = vector.load %arg6[%c0_30, %c0_31] : memref<128x256xf32, #tpu.memory_space<vmem>>, vector<128x256xf32>
    %cst_32 = arith.constant dense<0.000000e+00> : vector<8x256xf32>
    %85 = tpu.matmul %83, %84, %cst_32 {dimension_numbers = #tpu.dot_dimension_numbers<[1], [0], [0], [1], [0, 0, 1, 1], [], []>} : vector<8x128xf32>, vector<128x256xf32>, vector<8x256xf32> -> vector<8x256xf32>
    %86 = arith.addf %85, %11 : vector<8x256xf32>
    %87 = arith.negf %86 : vector<8x256xf32>
    %88 = math.exp %87 : vector<8x256xf32>
    %cst_33 = arith.constant 1.000000e+00 : f32
    %89 = vector.broadcast %cst_33 : f32 to vector<8x256xf32>
    %90 = arith.addf %89, %88 : vector<8x256xf32>
    %91 = arith.divf %89, %90 : vector<8x256xf32>
    %92 = vector.extract_strided_slice %91 {offsets = [0, 0], sizes = [8, 64], strides = [1, 1]} : vector<8x256xf32> to vector<8x64xf32>
    %93 = vector.extract_strided_slice %91 {offsets = [0, 64], sizes = [8, 64], strides = [1, 1]} : vector<8x256xf32> to vector<8x64xf32>
    %94 = vector.extract_strided_slice %91 {offsets = [0, 192], sizes = [8, 64], strides = [1, 1]} : vector<8x256xf32> to vector<8x64xf32>
    %95 = vector.extract_strided_slice %86 {offsets = [0, 128], sizes = [8, 64], strides = [1, 1]} : vector<8x256xf32> to vector<8x64xf32>
    %96 = math.tanh %95 : vector<8x64xf32>
    %97 = arith.mulf %93, %56 : vector<8x64xf32>
    %98 = arith.mulf %92, %96 : vector<8x64xf32>
    %99 = arith.addf %97, %98 : vector<8x64xf32>
    %100 = math.tanh %99 : vector<8x64xf32>
    %101 = arith.mulf %94, %100 : vector<8x64xf32>
    %c2_i32 = arith.constant 2 : i32
    %102 = arith.index_cast %c2_i32 : i32 to index
    %c0_34 = arith.constant 0 : index
    %c0_35 = arith.constant 0 : index
    %103 = vector.load %arg2[%102, %c0_34, %c0_35] : memref<8x8x1xf32, #tpu.memory_space<vmem>>, vector<1x8x1xf32>
    %104 = vector.shape_cast %103 : vector<1x8x1xf32> to vector<8x1xf32>
    %105 = vector.broadcast %104 : vector<8x1xf32> to vector<8x256xf32>
    %106 = arith.mulf %105, %5 : vector<8x256xf32>
    %107 = arith.addf %106, %8 : vector<8x256xf32>
    %c0_36 = arith.constant 0 : index
    %c0_37 = arith.constant 0 : index
    %108 = vector.load %arg5[%c0_36, %c0_37] : memref<64x256xf32, #tpu.memory_space<vmem>>, vector<64x256xf32>
    %cst_38 = arith.constant dense<0.000000e+00> : vector<8x256xf32>
    %109 = tpu.matmul %82, %108, %cst_38 {dimension_numbers = #tpu.dot_dimension_numbers<[1], [0], [0], [1], [0, 0, 1, 1], [], []>} : vector<8x64xf32>, vector<64x256xf32>, vector<8x256xf32> -> vector<8x256xf32>
    %110 = arith.addf %107, %109 : vector<8x256xf32>
    %111 = arith.negf %110 : vector<8x256xf32>
    %112 = math.exp %111 : vector<8x256xf32>
    %cst_39 = arith.constant 1.000000e+00 : f32
    %113 = vector.broadcast %cst_39 : f32 to vector<8x256xf32>
    %114 = arith.addf %113, %112 : vector<8x256xf32>
    %115 = arith.divf %113, %114 : vector<8x256xf32>
    %116 = vector.extract_strided_slice %115 {offsets = [0, 0], sizes = [8, 64], strides = [1, 1]} : vector<8x256xf32> to vector<8x64xf32>
    %117 = vector.extract_strided_slice %115 {offsets = [0, 64], sizes = [8, 64], strides = [1, 1]} : vector<8x256xf32> to vector<8x64xf32>
    %118 = vector.extract_strided_slice %115 {offsets = [0, 192], sizes = [8, 64], strides = [1, 1]} : vector<8x256xf32> to vector<8x64xf32>
    %119 = vector.extract_strided_slice %110 {offsets = [0, 128], sizes = [8, 64], strides = [1, 1]} : vector<8x256xf32> to vector<8x64xf32>
    %120 = math.tanh %119 : vector<8x64xf32>
    %121 = arith.mulf %117, %80 : vector<8x64xf32>
    %122 = arith.mulf %116, %120 : vector<8x64xf32>
    %123 = arith.addf %121, %122 : vector<8x64xf32>
    %124 = math.tanh %123 : vector<8x64xf32>
    %125 = arith.mulf %118, %124 : vector<8x64xf32>
    %126 = tpu.concatenate %125, %101 in 1 : vector<8x64xf32>, vector<8x64xf32> -> vector<8x128xf32>
    %c0_40 = arith.constant 0 : index
    %c0_41 = arith.constant 0 : index
    %127 = vector.load %arg6[%c0_40, %c0_41] : memref<128x256xf32, #tpu.memory_space<vmem>>, vector<128x256xf32>
    %cst_42 = arith.constant dense<0.000000e+00> : vector<8x256xf32>
    %128 = tpu.matmul %126, %127, %cst_42 {dimension_numbers = #tpu.dot_dimension_numbers<[1], [0], [0], [1], [0, 0, 1, 1], [], []>} : vector<8x128xf32>, vector<128x256xf32>, vector<8x256xf32> -> vector<8x256xf32>
    %129 = arith.addf %128, %11 : vector<8x256xf32>
    %130 = arith.negf %129 : vector<8x256xf32>
    %131 = math.exp %130 : vector<8x256xf32>
    %cst_43 = arith.constant 1.000000e+00 : f32
    %132 = vector.broadcast %cst_43 : f32 to vector<8x256xf32>
    %133 = arith.addf %132, %131 : vector<8x256xf32>
    %134 = arith.divf %132, %133 : vector<8x256xf32>
    %135 = vector.extract_strided_slice %134 {offsets = [0, 0], sizes = [8, 64], strides = [1, 1]} : vector<8x256xf32> to vector<8x64xf32>
    %136 = vector.extract_strided_slice %134 {offsets = [0, 64], sizes = [8, 64], strides = [1, 1]} : vector<8x256xf32> to vector<8x64xf32>
    %137 = vector.extract_strided_slice %134 {offsets = [0, 192], sizes = [8, 64], strides = [1, 1]} : vector<8x256xf32> to vector<8x64xf32>
    %138 = vector.extract_strided_slice %129 {offsets = [0, 128], sizes = [8, 64], strides = [1, 1]} : vector<8x256xf32> to vector<8x64xf32>
    %139 = math.tanh %138 : vector<8x64xf32>
    %140 = arith.mulf %136, %99 : vector<8x64xf32>
    %141 = arith.mulf %135, %139 : vector<8x64xf32>
    %142 = arith.addf %140, %141 : vector<8x64xf32>
    %143 = math.tanh %142 : vector<8x64xf32>
    %144 = arith.mulf %137, %143 : vector<8x64xf32>
    %c3_i32 = arith.constant 3 : i32
    %145 = arith.index_cast %c3_i32 : i32 to index
    %c0_44 = arith.constant 0 : index
    %c0_45 = arith.constant 0 : index
    %146 = vector.load %arg2[%145, %c0_44, %c0_45] : memref<8x8x1xf32, #tpu.memory_space<vmem>>, vector<1x8x1xf32>
    %147 = vector.shape_cast %146 : vector<1x8x1xf32> to vector<8x1xf32>
    %148 = vector.broadcast %147 : vector<8x1xf32> to vector<8x256xf32>
    %149 = arith.mulf %148, %5 : vector<8x256xf32>
    %150 = arith.addf %149, %8 : vector<8x256xf32>
    %c0_46 = arith.constant 0 : index
    %c0_47 = arith.constant 0 : index
    %151 = vector.load %arg5[%c0_46, %c0_47] : memref<64x256xf32, #tpu.memory_space<vmem>>, vector<64x256xf32>
    %cst_48 = arith.constant dense<0.000000e+00> : vector<8x256xf32>
    %152 = tpu.matmul %125, %151, %cst_48 {dimension_numbers = #tpu.dot_dimension_numbers<[1], [0], [0], [1], [0, 0, 1, 1], [], []>} : vector<8x64xf32>, vector<64x256xf32>, vector<8x256xf32> -> vector<8x256xf32>
    %153 = arith.addf %150, %152 : vector<8x256xf32>
    %154 = arith.negf %153 : vector<8x256xf32>
    %155 = math.exp %154 : vector<8x256xf32>
    %cst_49 = arith.constant 1.000000e+00 : f32
    %156 = vector.broadcast %cst_49 : f32 to vector<8x256xf32>
    %157 = arith.addf %156, %155 : vector<8x256xf32>
    %158 = arith.divf %156, %157 : vector<8x256xf32>
    %159 = vector.extract_strided_slice %158 {offsets = [0, 0], sizes = [8, 64], strides = [1, 1]} : vector<8x256xf32> to vector<8x64xf32>
    %160 = vector.extract_strided_slice %158 {offsets = [0, 64], sizes = [8, 64], strides = [1, 1]} : vector<8x256xf32> to vector<8x64xf32>
    %161 = vector.extract_strided_slice %158 {offsets = [0, 192], sizes = [8, 64], strides = [1, 1]} : vector<8x256xf32> to vector<8x64xf32>
    %162 = vector.extract_strided_slice %153 {offsets = [0, 128], sizes = [8, 64], strides = [1, 1]} : vector<8x256xf32> to vector<8x64xf32>
    %163 = math.tanh %162 : vector<8x64xf32>
    %164 = arith.mulf %160, %123 : vector<8x64xf32>
    %165 = arith.mulf %159, %163 : vector<8x64xf32>
    %166 = arith.addf %164, %165 : vector<8x64xf32>
    %167 = math.tanh %166 : vector<8x64xf32>
    %168 = arith.mulf %161, %167 : vector<8x64xf32>
    %169 = tpu.concatenate %168, %144 in 1 : vector<8x64xf32>, vector<8x64xf32> -> vector<8x128xf32>
    %c0_50 = arith.constant 0 : index
    %c0_51 = arith.constant 0 : index
    %170 = vector.load %arg6[%c0_50, %c0_51] : memref<128x256xf32, #tpu.memory_space<vmem>>, vector<128x256xf32>
    %cst_52 = arith.constant dense<0.000000e+00> : vector<8x256xf32>
    %171 = tpu.matmul %169, %170, %cst_52 {dimension_numbers = #tpu.dot_dimension_numbers<[1], [0], [0], [1], [0, 0, 1, 1], [], []>} : vector<8x128xf32>, vector<128x256xf32>, vector<8x256xf32> -> vector<8x256xf32>
    %172 = arith.addf %171, %11 : vector<8x256xf32>
    %173 = arith.negf %172 : vector<8x256xf32>
    %174 = math.exp %173 : vector<8x256xf32>
    %cst_53 = arith.constant 1.000000e+00 : f32
    %175 = vector.broadcast %cst_53 : f32 to vector<8x256xf32>
    %176 = arith.addf %175, %174 : vector<8x256xf32>
    %177 = arith.divf %175, %176 : vector<8x256xf32>
    %178 = vector.extract_strided_slice %177 {offsets = [0, 0], sizes = [8, 64], strides = [1, 1]} : vector<8x256xf32> to vector<8x64xf32>
    %179 = vector.extract_strided_slice %177 {offsets = [0, 64], sizes = [8, 64], strides = [1, 1]} : vector<8x256xf32> to vector<8x64xf32>
    %180 = vector.extract_strided_slice %177 {offsets = [0, 192], sizes = [8, 64], strides = [1, 1]} : vector<8x256xf32> to vector<8x64xf32>
    %181 = vector.extract_strided_slice %172 {offsets = [0, 128], sizes = [8, 64], strides = [1, 1]} : vector<8x256xf32> to vector<8x64xf32>
    %182 = math.tanh %181 : vector<8x64xf32>
    %183 = arith.mulf %179, %142 : vector<8x64xf32>
    %184 = arith.mulf %178, %182 : vector<8x64xf32>
    %185 = arith.addf %183, %184 : vector<8x64xf32>
    %186 = math.tanh %185 : vector<8x64xf32>
    %187 = arith.mulf %180, %186 : vector<8x64xf32>
    %c4_i32 = arith.constant 4 : i32
    %188 = arith.index_cast %c4_i32 : i32 to index
    %c0_54 = arith.constant 0 : index
    %c0_55 = arith.constant 0 : index
    %189 = vector.load %arg2[%188, %c0_54, %c0_55] : memref<8x8x1xf32, #tpu.memory_space<vmem>>, vector<1x8x1xf32>
    %190 = vector.shape_cast %189 : vector<1x8x1xf32> to vector<8x1xf32>
    %191 = vector.broadcast %190 : vector<8x1xf32> to vector<8x256xf32>
    %192 = arith.mulf %191, %5 : vector<8x256xf32>
    %193 = arith.addf %192, %8 : vector<8x256xf32>
    %c0_56 = arith.constant 0 : index
    %c0_57 = arith.constant 0 : index
    %194 = vector.load %arg5[%c0_56, %c0_57] : memref<64x256xf32, #tpu.memory_space<vmem>>, vector<64x256xf32>
    %cst_58 = arith.constant dense<0.000000e+00> : vector<8x256xf32>
    %195 = tpu.matmul %168, %194, %cst_58 {dimension_numbers = #tpu.dot_dimension_numbers<[1], [0], [0], [1], [0, 0, 1, 1], [], []>} : vector<8x64xf32>, vector<64x256xf32>, vector<8x256xf32> -> vector<8x256xf32>
    %196 = arith.addf %193, %195 : vector<8x256xf32>
    %197 = arith.negf %196 : vector<8x256xf32>
    %198 = math.exp %197 : vector<8x256xf32>
    %cst_59 = arith.constant 1.000000e+00 : f32
    %199 = vector.broadcast %cst_59 : f32 to vector<8x256xf32>
    %200 = arith.addf %199, %198 : vector<8x256xf32>
    %201 = arith.divf %199, %200 : vector<8x256xf32>
    %202 = vector.extract_strided_slice %201 {offsets = [0, 0], sizes = [8, 64], strides = [1, 1]} : vector<8x256xf32> to vector<8x64xf32>
    %203 = vector.extract_strided_slice %201 {offsets = [0, 64], sizes = [8, 64], strides = [1, 1]} : vector<8x256xf32> to vector<8x64xf32>
    %204 = vector.extract_strided_slice %201 {offsets = [0, 192], sizes = [8, 64], strides = [1, 1]} : vector<8x256xf32> to vector<8x64xf32>
    %205 = vector.extract_strided_slice %196 {offsets = [0, 128], sizes = [8, 64], strides = [1, 1]} : vector<8x256xf32> to vector<8x64xf32>
    %206 = math.tanh %205 : vector<8x64xf32>
    %207 = arith.mulf %203, %166 : vector<8x64xf32>
    %208 = arith.mulf %202, %206 : vector<8x64xf32>
    %209 = arith.addf %207, %208 : vector<8x64xf32>
    %210 = math.tanh %209 : vector<8x64xf32>
    %211 = arith.mulf %204, %210 : vector<8x64xf32>
    %212 = tpu.concatenate %211, %187 in 1 : vector<8x64xf32>, vector<8x64xf32> -> vector<8x128xf32>
    %c0_60 = arith.constant 0 : index
    %c0_61 = arith.constant 0 : index
    %213 = vector.load %arg6[%c0_60, %c0_61] : memref<128x256xf32, #tpu.memory_space<vmem>>, vector<128x256xf32>
    %cst_62 = arith.constant dense<0.000000e+00> : vector<8x256xf32>
    %214 = tpu.matmul %212, %213, %cst_62 {dimension_numbers = #tpu.dot_dimension_numbers<[1], [0], [0], [1], [0, 0, 1, 1], [], []>} : vector<8x128xf32>, vector<128x256xf32>, vector<8x256xf32> -> vector<8x256xf32>
    %215 = arith.addf %214, %11 : vector<8x256xf32>
    %216 = arith.negf %215 : vector<8x256xf32>
    %217 = math.exp %216 : vector<8x256xf32>
    %cst_63 = arith.constant 1.000000e+00 : f32
    %218 = vector.broadcast %cst_63 : f32 to vector<8x256xf32>
    %219 = arith.addf %218, %217 : vector<8x256xf32>
    %220 = arith.divf %218, %219 : vector<8x256xf32>
    %221 = vector.extract_strided_slice %220 {offsets = [0, 0], sizes = [8, 64], strides = [1, 1]} : vector<8x256xf32> to vector<8x64xf32>
    %222 = vector.extract_strided_slice %220 {offsets = [0, 64], sizes = [8, 64], strides = [1, 1]} : vector<8x256xf32> to vector<8x64xf32>
    %223 = vector.extract_strided_slice %220 {offsets = [0, 192], sizes = [8, 64], strides = [1, 1]} : vector<8x256xf32> to vector<8x64xf32>
    %224 = vector.extract_strided_slice %215 {offsets = [0, 128], sizes = [8, 64], strides = [1, 1]} : vector<8x256xf32> to vector<8x64xf32>
    %225 = math.tanh %224 : vector<8x64xf32>
    %226 = arith.mulf %222, %185 : vector<8x64xf32>
    %227 = arith.mulf %221, %225 : vector<8x64xf32>
    %228 = arith.addf %226, %227 : vector<8x64xf32>
    %229 = math.tanh %228 : vector<8x64xf32>
    %230 = arith.mulf %223, %229 : vector<8x64xf32>
    %c5_i32 = arith.constant 5 : i32
    %231 = arith.index_cast %c5_i32 : i32 to index
    %c0_64 = arith.constant 0 : index
    %c0_65 = arith.constant 0 : index
    %232 = vector.load %arg2[%231, %c0_64, %c0_65] : memref<8x8x1xf32, #tpu.memory_space<vmem>>, vector<1x8x1xf32>
    %233 = vector.shape_cast %232 : vector<1x8x1xf32> to vector<8x1xf32>
    %234 = vector.broadcast %233 : vector<8x1xf32> to vector<8x256xf32>
    %235 = arith.mulf %234, %5 : vector<8x256xf32>
    %236 = arith.addf %235, %8 : vector<8x256xf32>
    %c0_66 = arith.constant 0 : index
    %c0_67 = arith.constant 0 : index
    %237 = vector.load %arg5[%c0_66, %c0_67] : memref<64x256xf32, #tpu.memory_space<vmem>>, vector<64x256xf32>
    %cst_68 = arith.constant dense<0.000000e+00> : vector<8x256xf32>
    %238 = tpu.matmul %211, %237, %cst_68 {dimension_numbers = #tpu.dot_dimension_numbers<[1], [0], [0], [1], [0, 0, 1, 1], [], []>} : vector<8x64xf32>, vector<64x256xf32>, vector<8x256xf32> -> vector<8x256xf32>
    %239 = arith.addf %236, %238 : vector<8x256xf32>
    %240 = arith.negf %239 : vector<8x256xf32>
    %241 = math.exp %240 : vector<8x256xf32>
    %cst_69 = arith.constant 1.000000e+00 : f32
    %242 = vector.broadcast %cst_69 : f32 to vector<8x256xf32>
    %243 = arith.addf %242, %241 : vector<8x256xf32>
    %244 = arith.divf %242, %243 : vector<8x256xf32>
    %245 = vector.extract_strided_slice %244 {offsets = [0, 0], sizes = [8, 64], strides = [1, 1]} : vector<8x256xf32> to vector<8x64xf32>
    %246 = vector.extract_strided_slice %244 {offsets = [0, 64], sizes = [8, 64], strides = [1, 1]} : vector<8x256xf32> to vector<8x64xf32>
    %247 = vector.extract_strided_slice %244 {offsets = [0, 192], sizes = [8, 64], strides = [1, 1]} : vector<8x256xf32> to vector<8x64xf32>
    %248 = vector.extract_strided_slice %239 {offsets = [0, 128], sizes = [8, 64], strides = [1, 1]} : vector<8x256xf32> to vector<8x64xf32>
    %249 = math.tanh %248 : vector<8x64xf32>
    %250 = arith.mulf %246, %209 : vector<8x64xf32>
    %251 = arith.mulf %245, %249 : vector<8x64xf32>
    %252 = arith.addf %250, %251 : vector<8x64xf32>
    %253 = math.tanh %252 : vector<8x64xf32>
    %254 = arith.mulf %247, %253 : vector<8x64xf32>
    %255 = tpu.concatenate %254, %230 in 1 : vector<8x64xf32>, vector<8x64xf32> -> vector<8x128xf32>
    %c0_70 = arith.constant 0 : index
    %c0_71 = arith.constant 0 : index
    %256 = vector.load %arg6[%c0_70, %c0_71] : memref<128x256xf32, #tpu.memory_space<vmem>>, vector<128x256xf32>
    %cst_72 = arith.constant dense<0.000000e+00> : vector<8x256xf32>
    %257 = tpu.matmul %255, %256, %cst_72 {dimension_numbers = #tpu.dot_dimension_numbers<[1], [0], [0], [1], [0, 0, 1, 1], [], []>} : vector<8x128xf32>, vector<128x256xf32>, vector<8x256xf32> -> vector<8x256xf32>
    %258 = arith.addf %257, %11 : vector<8x256xf32>
    %259 = arith.negf %258 : vector<8x256xf32>
    %260 = math.exp %259 : vector<8x256xf32>
    %cst_73 = arith.constant 1.000000e+00 : f32
    %261 = vector.broadcast %cst_73 : f32 to vector<8x256xf32>
    %262 = arith.addf %261, %260 : vector<8x256xf32>
    %263 = arith.divf %261, %262 : vector<8x256xf32>
    %264 = vector.extract_strided_slice %263 {offsets = [0, 0], sizes = [8, 64], strides = [1, 1]} : vector<8x256xf32> to vector<8x64xf32>
    %265 = vector.extract_strided_slice %263 {offsets = [0, 64], sizes = [8, 64], strides = [1, 1]} : vector<8x256xf32> to vector<8x64xf32>
    %266 = vector.extract_strided_slice %263 {offsets = [0, 192], sizes = [8, 64], strides = [1, 1]} : vector<8x256xf32> to vector<8x64xf32>
    %267 = vector.extract_strided_slice %258 {offsets = [0, 128], sizes = [8, 64], strides = [1, 1]} : vector<8x256xf32> to vector<8x64xf32>
    %268 = math.tanh %267 : vector<8x64xf32>
    %269 = arith.mulf %265, %228 : vector<8x64xf32>
    %270 = arith.mulf %264, %268 : vector<8x64xf32>
    %271 = arith.addf %269, %270 : vector<8x64xf32>
    %272 = math.tanh %271 : vector<8x64xf32>
    %273 = arith.mulf %266, %272 : vector<8x64xf32>
    %c6_i32 = arith.constant 6 : i32
    %274 = arith.index_cast %c6_i32 : i32 to index
    %c0_74 = arith.constant 0 : index
    %c0_75 = arith.constant 0 : index
    %275 = vector.load %arg2[%274, %c0_74, %c0_75] : memref<8x8x1xf32, #tpu.memory_space<vmem>>, vector<1x8x1xf32>
    %276 = vector.shape_cast %275 : vector<1x8x1xf32> to vector<8x1xf32>
    %277 = vector.broadcast %276 : vector<8x1xf32> to vector<8x256xf32>
    %278 = arith.mulf %277, %5 : vector<8x256xf32>
    %279 = arith.addf %278, %8 : vector<8x256xf32>
    %c0_76 = arith.constant 0 : index
    %c0_77 = arith.constant 0 : index
    %280 = vector.load %arg5[%c0_76, %c0_77] : memref<64x256xf32, #tpu.memory_space<vmem>>, vector<64x256xf32>
    %cst_78 = arith.constant dense<0.000000e+00> : vector<8x256xf32>
    %281 = tpu.matmul %254, %280, %cst_78 {dimension_numbers = #tpu.dot_dimension_numbers<[1], [0], [0], [1], [0, 0, 1, 1], [], []>} : vector<8x64xf32>, vector<64x256xf32>, vector<8x256xf32> -> vector<8x256xf32>
    %282 = arith.addf %279, %281 : vector<8x256xf32>
    %283 = arith.negf %282 : vector<8x256xf32>
    %284 = math.exp %283 : vector<8x256xf32>
    %cst_79 = arith.constant 1.000000e+00 : f32
    %285 = vector.broadcast %cst_79 : f32 to vector<8x256xf32>
    %286 = arith.addf %285, %284 : vector<8x256xf32>
    %287 = arith.divf %285, %286 : vector<8x256xf32>
    %288 = vector.extract_strided_slice %287 {offsets = [0, 0], sizes = [8, 64], strides = [1, 1]} : vector<8x256xf32> to vector<8x64xf32>
    %289 = vector.extract_strided_slice %287 {offsets = [0, 64], sizes = [8, 64], strides = [1, 1]} : vector<8x256xf32> to vector<8x64xf32>
    %290 = vector.extract_strided_slice %287 {offsets = [0, 192], sizes = [8, 64], strides = [1, 1]} : vector<8x256xf32> to vector<8x64xf32>
    %291 = vector.extract_strided_slice %282 {offsets = [0, 128], sizes = [8, 64], strides = [1, 1]} : vector<8x256xf32> to vector<8x64xf32>
    %292 = math.tanh %291 : vector<8x64xf32>
    %293 = arith.mulf %289, %252 : vector<8x64xf32>
    %294 = arith.mulf %288, %292 : vector<8x64xf32>
    %295 = arith.addf %293, %294 : vector<8x64xf32>
    %296 = math.tanh %295 : vector<8x64xf32>
    %297 = arith.mulf %290, %296 : vector<8x64xf32>
    %298 = tpu.concatenate %297, %273 in 1 : vector<8x64xf32>, vector<8x64xf32> -> vector<8x128xf32>
    %c0_80 = arith.constant 0 : index
    %c0_81 = arith.constant 0 : index
    %299 = vector.load %arg6[%c0_80, %c0_81] : memref<128x256xf32, #tpu.memory_space<vmem>>, vector<128x256xf32>
    %cst_82 = arith.constant dense<0.000000e+00> : vector<8x256xf32>
    %300 = tpu.matmul %298, %299, %cst_82 {dimension_numbers = #tpu.dot_dimension_numbers<[1], [0], [0], [1], [0, 0, 1, 1], [], []>} : vector<8x128xf32>, vector<128x256xf32>, vector<8x256xf32> -> vector<8x256xf32>
    %301 = arith.addf %300, %11 : vector<8x256xf32>
    %302 = arith.negf %301 : vector<8x256xf32>
    %303 = math.exp %302 : vector<8x256xf32>
    %cst_83 = arith.constant 1.000000e+00 : f32
    %304 = vector.broadcast %cst_83 : f32 to vector<8x256xf32>
    %305 = arith.addf %304, %303 : vector<8x256xf32>
    %306 = arith.divf %304, %305 : vector<8x256xf32>
    %307 = vector.extract_strided_slice %306 {offsets = [0, 0], sizes = [8, 64], strides = [1, 1]} : vector<8x256xf32> to vector<8x64xf32>
    %308 = vector.extract_strided_slice %306 {offsets = [0, 64], sizes = [8, 64], strides = [1, 1]} : vector<8x256xf32> to vector<8x64xf32>
    %309 = vector.extract_strided_slice %306 {offsets = [0, 192], sizes = [8, 64], strides = [1, 1]} : vector<8x256xf32> to vector<8x64xf32>
    %310 = vector.extract_strided_slice %301 {offsets = [0, 128], sizes = [8, 64], strides = [1, 1]} : vector<8x256xf32> to vector<8x64xf32>
    %311 = math.tanh %310 : vector<8x64xf32>
    %312 = arith.mulf %308, %271 : vector<8x64xf32>
    %313 = arith.mulf %307, %311 : vector<8x64xf32>
    %314 = arith.addf %312, %313 : vector<8x64xf32>
    %315 = math.tanh %314 : vector<8x64xf32>
    %316 = arith.mulf %309, %315 : vector<8x64xf32>
    %c7_i32 = arith.constant 7 : i32
    %317 = arith.index_cast %c7_i32 : i32 to index
    %c0_84 = arith.constant 0 : index
    %c0_85 = arith.constant 0 : index
    %318 = vector.load %arg2[%317, %c0_84, %c0_85] : memref<8x8x1xf32, #tpu.memory_space<vmem>>, vector<1x8x1xf32>
    %319 = vector.shape_cast %318 : vector<1x8x1xf32> to vector<8x1xf32>
    %320 = vector.broadcast %319 : vector<8x1xf32> to vector<8x256xf32>
    %321 = arith.mulf %320, %5 : vector<8x256xf32>
    %322 = arith.addf %321, %8 : vector<8x256xf32>
    %c0_86 = arith.constant 0 : index
    %c0_87 = arith.constant 0 : index
    %323 = vector.load %arg5[%c0_86, %c0_87] : memref<64x256xf32, #tpu.memory_space<vmem>>, vector<64x256xf32>
    %cst_88 = arith.constant dense<0.000000e+00> : vector<8x256xf32>
    %324 = tpu.matmul %297, %323, %cst_88 {dimension_numbers = #tpu.dot_dimension_numbers<[1], [0], [0], [1], [0, 0, 1, 1], [], []>} : vector<8x64xf32>, vector<64x256xf32>, vector<8x256xf32> -> vector<8x256xf32>
    %325 = arith.addf %322, %324 : vector<8x256xf32>
    %326 = arith.negf %325 : vector<8x256xf32>
    %327 = math.exp %326 : vector<8x256xf32>
    %cst_89 = arith.constant 1.000000e+00 : f32
    %328 = vector.broadcast %cst_89 : f32 to vector<8x256xf32>
    %329 = arith.addf %328, %327 : vector<8x256xf32>
    %330 = arith.divf %328, %329 : vector<8x256xf32>
    %331 = vector.extract_strided_slice %330 {offsets = [0, 0], sizes = [8, 64], strides = [1, 1]} : vector<8x256xf32> to vector<8x64xf32>
    %332 = vector.extract_strided_slice %330 {offsets = [0, 64], sizes = [8, 64], strides = [1, 1]} : vector<8x256xf32> to vector<8x64xf32>
    %333 = vector.extract_strided_slice %330 {offsets = [0, 192], sizes = [8, 64], strides = [1, 1]} : vector<8x256xf32> to vector<8x64xf32>
    %334 = vector.extract_strided_slice %325 {offsets = [0, 128], sizes = [8, 64], strides = [1, 1]} : vector<8x256xf32> to vector<8x64xf32>
    %335 = math.tanh %334 : vector<8x64xf32>
    %336 = arith.mulf %332, %295 : vector<8x64xf32>
    %337 = arith.mulf %331, %335 : vector<8x64xf32>
    %338 = arith.addf %336, %337 : vector<8x64xf32>
    %339 = math.tanh %338 : vector<8x64xf32>
    %340 = arith.mulf %333, %339 : vector<8x64xf32>
    %341 = tpu.concatenate %340, %316 in 1 : vector<8x64xf32>, vector<8x64xf32> -> vector<8x128xf32>
    %c0_90 = arith.constant 0 : index
    %c0_91 = arith.constant 0 : index
    %342 = vector.load %arg6[%c0_90, %c0_91] : memref<128x256xf32, #tpu.memory_space<vmem>>, vector<128x256xf32>
    %cst_92 = arith.constant dense<0.000000e+00> : vector<8x256xf32>
    %343 = tpu.matmul %341, %342, %cst_92 {dimension_numbers = #tpu.dot_dimension_numbers<[1], [0], [0], [1], [0, 0, 1, 1], [], []>} : vector<8x128xf32>, vector<128x256xf32>, vector<8x256xf32> -> vector<8x256xf32>
    %344 = arith.addf %343, %11 : vector<8x256xf32>
    %345 = arith.negf %344 : vector<8x256xf32>
    %346 = math.exp %345 : vector<8x256xf32>
    %cst_93 = arith.constant 1.000000e+00 : f32
    %347 = vector.broadcast %cst_93 : f32 to vector<8x256xf32>
    %348 = arith.addf %347, %346 : vector<8x256xf32>
    %349 = arith.divf %347, %348 : vector<8x256xf32>
    %350 = vector.extract_strided_slice %349 {offsets = [0, 0], sizes = [8, 64], strides = [1, 1]} : vector<8x256xf32> to vector<8x64xf32>
    %351 = vector.extract_strided_slice %349 {offsets = [0, 64], sizes = [8, 64], strides = [1, 1]} : vector<8x256xf32> to vector<8x64xf32>
    %352 = vector.extract_strided_slice %349 {offsets = [0, 192], sizes = [8, 64], strides = [1, 1]} : vector<8x256xf32> to vector<8x64xf32>
    %353 = vector.extract_strided_slice %344 {offsets = [0, 128], sizes = [8, 64], strides = [1, 1]} : vector<8x256xf32> to vector<8x64xf32>
    %354 = math.tanh %353 : vector<8x64xf32>
    %355 = arith.mulf %351, %314 : vector<8x64xf32>
    %356 = arith.mulf %350, %354 : vector<8x64xf32>
    %357 = arith.addf %355, %356 : vector<8x64xf32>
    %358 = math.tanh %357 : vector<8x64xf32>
    %359 = arith.mulf %352, %358 : vector<8x64xf32>
    %c8_i32 = arith.constant 8 : i32
    %c0_94 = arith.constant 0 : index
    %c0_95 = arith.constant 0 : index
    %360 = vector.load %arg11[%c0_94, %c0_95] : memref<8x64xf32, #tpu.memory_space<vmem>>, vector<8x64xf32>
    tpu.vector_store %arg11[%c0_94, %c0_95], %340 {strides = array<i32>} : memref<8x64xf32, #tpu.memory_space<vmem>>, vector<8x64xf32>,
    %c0_96 = arith.constant 0 : index
    %c0_97 = arith.constant 0 : index
    %361 = vector.load %arg12[%c0_96, %c0_97] : memref<8x64xf32, #tpu.memory_space<vmem>>, vector<8x64xf32>
    tpu.vector_store %arg12[%c0_96, %c0_97], %338 {strides = array<i32>} : memref<8x64xf32, #tpu.memory_space<vmem>>, vector<8x64xf32>,
    %c0_98 = arith.constant 0 : index
    %c0_99 = arith.constant 0 : index
    %362 = vector.load %arg13[%c0_98, %c0_99] : memref<8x64xf32, #tpu.memory_space<vmem>>, vector<8x64xf32>
    tpu.vector_store %arg13[%c0_98, %c0_99], %359 {strides = array<i32>} : memref<8x64xf32, #tpu.memory_space<vmem>>, vector<8x64xf32>,
    %c0_100 = arith.constant 0 : index
    %c0_101 = arith.constant 0 : index
    %363 = vector.load %arg14[%c0_100, %c0_101] : memref<8x64xf32, #tpu.memory_space<vmem>>, vector<8x64xf32>
    tpu.vector_store %arg14[%c0_100, %c0_101], %357 {strides = array<i32>} : memref<8x64xf32, #tpu.memory_space<vmem>>, vector<8x64xf32>,
    %c0_i32_102 = arith.constant 0 : i32
    %364 = arith.cmpi eq, %arg1, %c0_i32_102 : i32
    %365 = arith.extui %364 : i1 to i32
    %c0_i32_103 = arith.constant 0 : i32
    %366 = arith.cmpi ne, %365, %c0_i32_103 : i32
    scf.if %366 {
      %c0_104 = arith.constant 0 : index
      %c0_105 = arith.constant 0 : index
      %367 = vector.load %arg13[%c0_104, %c0_105] : memref<8x64xf32, #tpu.memory_space<vmem>>, vector<8x64xf32>
      %c0_106 = arith.constant 0 : index
      %c0_107 = arith.constant 0 : index
      %368 = vector.load %arg8[%c0_106, %c0_107] : memref<1x64xf32, #tpu.memory_space<vmem>>, vector<1x64xf32>
      %369 = vector.broadcast %368 : vector<1x64xf32> to vector<8x64xf32>
      %370 = arith.mulf %367, %369 : vector<8x64xf32>
      %cst_108 = arith.constant dense<0.000000e+00> : vector<8xf32>
      %371 = vector.multi_reduction <add>, %370, %cst_108 [1] : vector<8x64xf32> to vector<8xf32>
      %372 = vector.shape_cast %371 : vector<8xf32> to vector<8x1xf32>
      %c0_109 = arith.constant 0 : index
      %c0_110 = arith.constant 0 : index
      %373 = vector.load %arg9[%c0_109, %c0_110] : memref<8x1xf32, #tpu.memory_space<vmem>>, vector<8x1xf32>
      %374 = arith.addf %372, %373 : vector<8x1xf32>
      %c0_111 = arith.constant 0 : index
      %c0_112 = arith.constant 0 : index
      %375 = vector.load %arg10[%c0_111, %c0_112] : memref<8x1xf32, #tpu.memory_space<vmem>>, vector<8x1xf32>
      tpu.vector_store %arg10[%c0_111, %c0_112], %374 {strides = array<i32>} : memref<8x1xf32, #tpu.memory_space<vmem>>, vector<8x1xf32>,
    } else {
    }
    return
  }
  func.func @transform_0(%arg0: i32, %arg1: i32) -> (i32, i32, i32) {
    %c0_i32 = arith.constant 0 : i32
    %c0_i32_0 = arith.constant 0 : i32
    return %arg1, %arg0, %c0_i32 : i32, i32, i32
  }
  func.func @transform_1(%arg0: i32, %arg1: i32) -> (i32, i32) {
    %c0_i32 = arith.constant 0 : i32
    %c0_i32_0 = arith.constant 0 : i32
    %c0_i32_1 = arith.constant 0 : i32
    return %c0_i32, %c0_i32_0 : i32, i32
  }
  func.func @transform_2(%arg0: i32, %arg1: i32) -> (i32, i32) {
    %c0_i32 = arith.constant 0 : i32
    %c0_i32_0 = arith.constant 0 : i32
    %c0_i32_1 = arith.constant 0 : i32
    return %c0_i32, %c0_i32_0 : i32, i32
  }
  func.func @transform_3(%arg0: i32, %arg1: i32) -> (i32, i32) {
    %c0_i32 = arith.constant 0 : i32
    %c0_i32_0 = arith.constant 0 : i32
    %c0_i32_1 = arith.constant 0 : i32
    return %c0_i32, %c0_i32_0 : i32, i32
  }
  func.func @transform_4(%arg0: i32, %arg1: i32) -> (i32, i32) {
    %c0_i32 = arith.constant 0 : i32
    %c0_i32_0 = arith.constant 0 : i32
    %c0_i32_1 = arith.constant 0 : i32
    return %c0_i32, %c0_i32_0 : i32, i32
  }
  func.func @transform_5(%arg0: i32, %arg1: i32) -> (i32, i32) {
    %c0_i32 = arith.constant 0 : i32
    %c0_i32_0 = arith.constant 0 : i32
    %c0_i32_1 = arith.constant 0 : i32
    return %c0_i32, %c0_i32_0 : i32, i32
  }
  func.func @transform_6(%arg0: i32, %arg1: i32) -> (i32, i32) {
    %c0_i32 = arith.constant 0 : i32
    %c0_i32_0 = arith.constant 0 : i32
    %c0_i32_1 = arith.constant 0 : i32
    return %c0_i32, %c0_i32_0 : i32, i32
  }
  func.func @transform_7(%arg0: i32, %arg1: i32) -> (i32, i32) {
    %c0_i32 = arith.constant 0 : i32
    %c0_i32_0 = arith.constant 0 : i32
    return %arg0, %c0_i32 : i32, i32
  }
  func.func @transform_8(%arg0: i32, %arg1: i32) -> (i32, i32) {
    %c0_i32 = arith.constant 0 : i32
    %c0_i32_0 = arith.constant 0 : i32
    return %arg0, %c0_i32 : i32, i32
  }
}

</mosaic_0001>

<bundles_post_ra>
// kernel: tpu_custom_call.1
= control target key start
LH: loop header
LB: loop body
LE: loop exit
PB: predicated region body
PF: predicated region fallthrough
CT: control target
= control target key end

     0   :  { %13 = vsyncpa [#allocation7], 0  ;;  %s3112_s0 = inlined_call_operand.vmem [shape: f32[8,8,1], index: 0, kind: input, shape index: {}]   ;;  %s3113_s1 = inlined_call_operand.vmem [shape: f32[1,256], index: 1, kind: input, shape index: {}]   ;;  %s3114_s2 = inlined_call_operand.vmem [shape: f32[1,256], index: 2, kind: input, shape index: {}]   ;;  %s3115_s3 = inlined_call_operand.hbm [shape: f32[64,256], index: 3, kind: input, shape index: {}]   ;;  %s3116_s4 = inlined_call_operand.hbm [shape: f32[128,256], index: 4, kind: input, shape index: {}]   ;;  %s3117_s5 = inlined_call_operand.vmem [shape: f32[1,256], index: 5, kind: input, shape index: {}]   ;;  %s3118_s6 = inlined_call_operand.vmem [shape: f32[1,64], index: 6, kind: input, shape index: {}]   ;;  %s3119_s7 = inlined_call_operand.vmem [shape: f32[8,1], index: 7, kind: input, shape index: {}]   ;;  %s3120_s8 = inlined_call_operand.vmem [shape: f32[8,1], index: 8, kind: output, shape index: {}]  }
   0x1   :  { %14 = vsyncpa [#allocation9], 0  ;;  %s2537_s27 = smov [#allocation6]   ;;  %s2489_s9 = scalar_lea.hbm %s3115_s3, 2048 }
   0x2   :  { %s26_s28 = sshll.u32 %s2537_s27, 4  ;;  %p2490_p0 = scmp.ne.s32.totalorder %s3115_s3, %s2489_s9  ;;  %s27_s28 = int_to_ptr.vmem [resolvable:$true] %s26_s28 }
   0x3   :  { %p2493_p1 = scmp.lt.u32.totalorder %s2489_s9, %s3115_s3 }
   0x5   :  { %p2495_p2 = pnand %p2493_p1, %p2490_p0 }
   0x7   :  { %2498 = shalt.err (!%p2495_p2)
}
   0x8   :  { %s2499_s14 = scalar_lea.vmem %s27_s28, 2048  ;;  %p2504_p4 = scmp.lt.s32.totalorder %s27_s28, %s27_s28 }
   0x9   :  { %p2500_p3 = scmp.ne.s32.totalorder %s27_s28, %s2499_s14  ;;  %p2505_p5 = scmp.lt.s32.totalorder %s2499_s14, %s2499_s14 }
   0xb   :  { %p2506_p6 = por %p2505_p5, %p2504_p4 }
   0xd   :  { %p2507_p7 = pnand %p2506_p6, %p2500_p3 }
   0xf   :  { %2510 = shalt.err (!%p2507_p7)
}
  0x10   :  { %s2538_s15 = smov 256   ;;  %s2539_s16 = smov 16  }
  0x11   :  { %32 = dma.hbm_to_vmem [thread:$0]  %s3115_s3, 2048, %s27_s28, [#allocation7], %s2538_s15, %s2538_s15, %s2539_s16  }
  0x12   :  { %s2540_s19 = smov [#allocation8]   ;;  %s2511_s23 = scalar_lea.hbm %s3116_s4, 4096 }
  0x13   :  { %s38_s20 = sshll.u32 %s2540_s19, 4  ;;  %p2512_p8 = scmp.ne.s32.totalorder %s3116_s4, %s2511_s23  ;;  %s39_s20 = int_to_ptr.vmem [resolvable:$true] %s38_s20 }
  0x14   :  { %p2515_p9 = scmp.lt.u32.totalorder %s2511_s23, %s3116_s4 }
  0x16   :  { %p2517_p10 = pnand %p2515_p9, %p2512_p8 }
  0x18   :  { %2520 = shalt.err (!%p2517_p10)
}
  0x19   :  { %s2521_s29 = scalar_lea.vmem %s39_s20, 4096  ;;  %p2526_p12 = scmp.lt.s32.totalorder %s39_s20, %s39_s20 }
  0x1a   :  { %p2522_p11 = scmp.ne.s32.totalorder %s39_s20, %s2521_s29  ;;  %p2527_p13 = scmp.lt.s32.totalorder %s2521_s29, %s2521_s29 }
  0x1c   :  { %p2528_p0 = por %p2527_p13, %p2526_p12 }
  0x1e   :  { %p2529_p1 = pnand %p2528_p0, %p2522_p11 }
  0x20   :  { %2532 = shalt.err (!%p2529_p1)
}
  0x21   :  { %44 = dma.hbm_to_vmem [thread:$0]  %s3116_s4, 4096, %s39_s20, [#allocation9], %s2538_s15, %s2538_s15, %s2539_s16  }
  0x22   :  { %2533 = dma.done.wait [#allocation7], 2048  }
  0x23   :  { %2534 = vsyncadd [#allocation7], 4294965248 }
  0x24   :  { %2535 = dma.done.wait [#allocation9], 4096  }
  0x25   :  { %2536 = vsyncadd [#allocation9], 4294963200  ;;  %vm61_vm0 = vcmask 523264   ;;  %v2541_v0 = vmov 0.0   ;;  %v2542_v1 = vmov 0   ;;  %v117_v2 = vld [vmem:[#allocation6 + $0x8] sm:$0xff]  ;;  %v68_v32 = vlaneseq }
  0x26   :  { %200 = vmatprep.mubr.f32.mxu1 %v2541_v0  ;;  %62 = vst.msk [vmem:[#allocation2] sm:$0xff] %vm61_vm0, %v2541_v0  ;;  %63 = vst.msk [vmem:[#allocation3] sm:$0xff] %vm61_vm0, %v2541_v0  ;;  %2295 = vset.pattern.permute.xlu0 %v2542_v1  ;;  %v119_v3 = vld [vmem:[#allocation6 + $0x18] sm:$0xff]  ;;  %v116_v4 = vld [vmem:[#allocation6] sm:$0xff]  ;;  %s2543_s9 = smov 64   ;;  %vm1848_vm1 = vcmask 7168  }
  0x27   :  { %64 = vst.msk [vmem:[#allocation4] sm:$0xff] %vm61_vm0, %v2541_v0  ;;  %65 = vst.msk [vmem:[#allocation5] sm:$0xff] %vm61_vm0, %v2541_v0  ;;  %450 = vmatprep.mubr.f32.mxu0 %v2541_v0  ;;  %2296 = vset.pattern.permute.xlu1 %v2542_v1  ;;  %v2623_v5 = vpack.c.bf16 %v119_v3, %v117_v2  ;;  %v118_v6 = vld [vmem:[#allocation6 + $0x10] sm:$0xff]  ;;  %v121_v7 = vld [vmem:[#allocation6 + $0x28] sm:$0xff]  ;;  %v69_v33 = vshrl.u32 %v68_v32, 7 }
  0x28   :  { %v123_v8 = vld [vmem:[#allocation6 + $0x38] sm:$0xff]  ;;  %v2625_v9 = vpack.c.bf16 %v118_v6, %v116_v4  ;;  %v120_v11 = vld [vmem:[#allocation6 + $0x20] sm:$0xff]  ;;  %v122_v12 = vld [vmem:[#allocation6 + $0x30] sm:$0xff] }
  0x29   :  { %v2627_v10 = vpack.c.bf16 %v123_v8, %v121_v7  ;;  %v125_v13 = vld [vmem:[#allocation6 + $0x48] sm:$0xff]  ;;  %1905 = vmatprep.subr.bf16.mxu1 %v2623_v5  ;;  %v127_v14 = vld [vmem:[#allocation6 + $0x58] sm:$0xff]  ;;  %1953 = vmatprep.subr.bf16.mxu0 %v2623_v5  ;;  %v2632_v15 = vpack.c.bf16 %v122_v12, %v120_v11  ;;  %v124_v17 = vld [vmem:[#allocation6 + $0x40] sm:$0xff]  ;;  %v2668_v34 = vsub.s32 0, %v69_v33  ;;  %v2683_v41 = vsub.s32 1, %v69_v33 }
  0x2a   :  { %1907 = vmatpush1.bf16.msra.mxu1 %v2625_v9  ;;  %1955 = vmatpush1.bf16.msra.mxu0 %v2625_v9  ;;  %v2636_v16 = vpack.c.bf16 %v127_v14, %v125_v13  ;;  %v126_v18 = vld [vmem:[#allocation6 + $0x50] sm:$0xff]  ;;  %v106_v19 = vld [vmem:[%s3112_s0] sm:$0xff]  ;;  %v129_v20 = vld [vmem:[#allocation6 + $0x68] sm:$0xff] }
  0x2b   :  { %1909 = vmatprep.subr.bf16.mxu1 %v2627_v10  ;;  %1957 = vmatprep.subr.bf16.mxu0 %v2627_v10  ;;  %v131_v21 = vld [vmem:[#allocation6 + $0x78] sm:$0xff]  ;;  %v2643_v23 = vpack.c.bf16 %v126_v18, %v124_v17  ;;  %v128_v25 = vld [vmem:[#allocation6 + $0x60] sm:$0xff]  ;;  %v130_v26 = vld [vmem:[#allocation6 + $0x70] sm:$0xff] }
  0x2c   :  { %109 = vperm.xlu0 %2295, %v106_v19   ;;  %v2647_v24 = vpack.c.bf16 %v131_v21, %v129_v20  ;;  %v1861_v27 = vld [vmem:[%s3112_s0 + $0x8] sm:$0xff]  ;;  %v2655_v28 = vpack.c.bf16 %v130_v26, %v128_v25  ;;  %v1867_v31 = vld [vmem:[%s3112_s0 + $0x10] sm:$0xff]  ;;  %v66_v35 = vld [vmem:[%s3113_s1] sm:$0x3] }
  0x2d   :  { %v103_v22 = vld [vmem:[#allocation3] sm:$0xff]  ;;  %v102_v30 = vld [vmem:[#allocation2] sm:$0xff]  ;;  %v2674_v36 = vrot.slane %v66_v35, %v2668_v34  ;;  %v2687_v44 = vrot.slane %v66_v35, %v2683_v41  ;;  %v247_v58 = vld [vmem:[#allocation8 + $0x18] sm:$0xff] }
  0x2e   :  { %1911 = vmatpush1.bf16.msra.mxu1 %v2632_v15  ;;  %1959 = vmatpush1.bf16.msra.mxu0 %v2632_v15  ;;  %v104_v29 = vld [vmem:[#allocation4] sm:$0xff]  ;;  %v78_v37 = vld [vmem:[%s3114_s2] sm:$0x3]  ;;  %v245_v57 = vld [vmem:[#allocation8 + $0x8] sm:$0xff] }
  0x2f   :  { %1913 = vmatprep.subr.bf16.mxu1 %v2636_v16  ;;  %1961 = vmatprep.subr.bf16.mxu0 %v2636_v16  ;;  %v2681_v40 = vrot.slane %v78_v37, %v2668_v34  ;;  %v2691_v49 = vrot.slane %v78_v37, %v2683_v41  ;;  %v244_v59 = vld [vmem:[#allocation8] sm:$0xff]  ;;  %v2701_v60 = vpack.c.bf16 %v247_v58, %v245_v57  ;;  %v246_v61 = vld [vmem:[#allocation8 + $0x10] sm:$0xff]  ;;  %v249_v62 = vld [vmem:[#allocation8 + $0x28] sm:$0xff] }
  0x30   :  { %223 = vrot.lane.b32.xlu0 %v103_v22, %s2543_s9  ;;  %v251_v63 = vld [vmem:[#allocation8 + $0x38] sm:$0xff]  ;;  %v2703_v1 = vpack.c.bf16 %v246_v61, %v244_v59  ;;  %v248_v3 = vld [vmem:[#allocation8 + $0x20] sm:$0xff]  ;;  %v250_v4 = vld [vmem:[#allocation8 + $0x30] sm:$0xff] }
  0x31   :  { %v2705_v2 = vpack.c.bf16 %v251_v63, %v249_v62  ;;  %v253_v6 = vld [vmem:[#allocation8 + $0x48] sm:$0xff]  ;;  %v255_v7 = vld [vmem:[#allocation8 + $0x58] sm:$0xff]  ;;  %v2710_v8 = vpack.c.bf16 %v250_v4, %v248_v3  ;;  %v252_v12 = vld [vmem:[#allocation8 + $0x40] sm:$0xff] }
  0x32   :  { %1915 = vmatpush1.bf16.msra.mxu1 %v2643_v23  ;;  %1963 = vmatpush1.bf16.msra.mxu0 %v2643_v23  ;;  %v2713_v11 = vpack.c.bf16 %v255_v7, %v253_v6  ;;  %v254_v13 = vld [vmem:[#allocation8 + $0x50] sm:$0xff]  ;;  %v257_v14 = vld [vmem:[#allocation8 + $0x68] sm:$0xff]  ;;  %v259_v17 = vld [vmem:[#allocation8 + $0x78] sm:$0xff] }
  0x33   :  { %1917 = vmatprep.subr.bf16.mxu1 %v2647_v24  ;;  %1965 = vmatprep.subr.bf16.mxu0 %v2647_v24  ;;  %v2716_v18 = vpack.c.bf16 %v254_v13, %v252_v12  ;;  %v2719_v19 = vpack.c.bf16 %v259_v17, %v257_v14  ;;  %v256_v20 = vld [vmem:[#allocation8 + $0x60] sm:$0xff]  ;;  %v258_v21 = vld [vmem:[#allocation8 + $0x70] sm:$0xff]  ;;  %v261_v22 = vld [vmem:[#allocation8 + $0x88] sm:$0xff] }
  0x34   :  { %377 = vperm.xlu0 %2295, %v1861_v27   ;;  %v263_v25 = vld [vmem:[#allocation8 + $0x98] sm:$0xff]  ;;  %v2722_v26 = vpack.c.bf16 %v258_v21, %v256_v20  ;;  %v264_v37 = vld [vmem:[#allocation8 + $0xa0] sm:$0xff] }
  0x35   :  { %v2725_v27 = vpack.c.bf16 %v263_v25, %v261_v22  ;;  %v267_v32 = vld [vmem:[#allocation8 + $0xb8] sm:$0xff]  ;;  %v90_v21 = vld [vmem:[%s3117_s5] sm:$0x3] }
  0x36   :  { %1919 = vmatpush1.bf16.msra.mxu1 %v2655_v28  ;;  %1967 = vmatpush1.bf16.msra.mxu0 %v2655_v28  ;;  %v105_v6 = vld [vmem:[#allocation5] sm:$0xff]  ;;  %v2792_v25 = vrot.slane %v90_v21, %v2668_v34 }
  0x37   :  { %1921 = vmatprep.subr.bf16.mxu1 %v2701_v60  ;;  %1969 = vmatprep.subr.bf16.mxu0 %v2701_v60 }
  0x38   :  { %240 = vrot.lane.b32.xlu0 %v104_v29, %s2543_s9  ;;  %v260_v29 = vld [vmem:[#allocation8 + $0x80] sm:$0xff] }
  0x39   :  { %1856 = vmatmul.mubr.msk.f32.vlgmr.msra.gmra.mrb[0].mxu1 %vm61_vm0, %v102_v30  ;;  %v262_v30 = vld [vmem:[#allocation8 + $0x90] sm:$0xff] }
  0x3a   :  { %340 = vmatprep.mubr.f32.mxu1 %v2541_v0  ;;  %1923 = vmatpush1.bf16.msra.mxu1 %v2703_v1  ;;  %v2728_v33 = vpack.c.bf16 %v262_v30, %v260_v29 }
  0x3b   :  { %1925 = vmatprep.subr.bf16.mxu1 %v2705_v2 }
  0x3c   :  { %583 = vperm.xlu0 %2295, %v1867_v31   ;;  %v265_v31 = vld [vmem:[#allocation8 + $0xa8] sm:$0xff] }
  0x3d   :  { %v2731_v35 = vpack.c.bf16 %v267_v32, %v265_v31 }
  0x3e   :  { %1927 = vmatpush1.bf16.msra.mxu1 %v2710_v8 }
  0x3f   :  { %1929 = vmatprep.subr.bf16.mxu1 %v2713_v11 }
  0x40   :  { %361 = vrot.lane.b32.xlu0 %v105_v6, %s2543_s9 }
  0x42   :  { %1931 = vmatpush1.bf16.msra.mxu1 %v2716_v18 }
  0x43   :  { %1933 = vmatprep.subr.bf16.mxu1 %v2719_v19 }
  0x46   :  { %1935 = vmatpush1.bf16.msra.mxu1 %v2722_v26 }
  0x47   :  { %1937 = vmatprep.subr.bf16.mxu1 %v2725_v27 }
  0x4a   :  { %1939 = vmatpush1.bf16.msra.mxu1 %v2728_v33 }
  0x4b   :  { %1941 = vmatprep.subr.bf16.mxu1 %v2731_v35 }
  0xab   :  { %v110_v38 = vpop.permute.xlu0 %109 }
  0xac   :  { %v112_v39 = vmul.f32 %v110_v38, %v2674_v36  ;;  %v113_v48 = vmul.f32 %v110_v38, %v2687_v44  ;;  %v266_v38 = vld [vmem:[#allocation8 + $0xb0] sm:$0xff] }
  0xae   :  { %v114_v42 = vadd.f32 %v112_v39, %v2681_v40  ;;  %v115_v50 = vadd.f32 %v113_v48, %v2691_v49  ;;  %v269_v39 = vld [vmem:[#allocation8 + $0xc8] sm:$0xff] }
  0xaf   :  { %v273_v48 = vld [vmem:[#allocation8 + $0xe8] sm:$0xff]  ;;  %v224_v61 = vpop.permute.xlu0 %223 }
 0x10c   :  { %v202_v43 = vpop.f32.mrb[0].mxu1 }
 0x10d   :  { %v207_v45 = vadd.f32 %v202_v43, %v114_v42  ;;  %v204_v46 = vpop.f32.mrb[1].mxu1  ;;  %v271_v42 = vld [vmem:[#allocation8 + $0xd8] sm:$0xff]  ;;  %v2734_v43 = vpack.c.bf16 %v266_v38, %v264_v37 }
 0x10e   :  { %v2694_v51 = vadd.f32 %v204_v46, %v115_v50  ;;  %v268_v46 = vld [vmem:[#allocation8 + $0xc0] sm:$0xff]  ;;  %v275_v50 = vld [vmem:[#allocation8 + $0xf8] sm:$0xff] }
 0x10f   :  { %v1857_v47 = vmul.f32 -1.442695, %v207_v45  ;;  %v2737_v45 = vpack.c.bf16 %v271_v42, %v269_v39  ;;  %1943 = vmatpush1.bf16.msra.mxu1 %v2734_v43 }
 0x110   :  { %v1858_v58 = vmul.f32 -1.442695, %v2694_v51 }
 0x111   :  { %2297 = vpow2.f32 %v1857_v47  ;;  %v270_v47 = vld [vmem:[#allocation8 + $0xd0] sm:$0xff]  ;;  %1945 = vmatprep.subr.bf16.mxu1 %v2737_v45 }
 0x112   :  { %2299 = vtanh.f32 %v2694_v51  ;;  %v378_v51 = vpop.permute.xlu0 %377 }
 0x113   :  { %v381_v22 = vmul.f32 %v378_v51, %v2687_v44 }
 0x115   :  { %v383_v31 = vadd.f32 %v381_v22, %v2691_v49 }
 0x116   :  { %v241_v14 = vpop.permute.xlu0 %240 }
 0x11b   :  { %v2298_v52 = vpop.eup %2297 }
 0x11c   :  { %v215_v53 = vadd.f32 1.0, %v2298_v52  ;;  %v2300_v54 = vpop.eup %2299  ;;  %v2740_v52 = vpack.c.bf16 %v270_v47, %v268_v46 }
 0x11e   :  { %2301 = vrcp.f32 %v215_v53  ;;  %v2743_v53 = vpack.c.bf16 %v275_v50, %v273_v48  ;;  %1947 = vmatpush1.bf16.msra.mxu1 %v2740_v52  ;;  %v2798_v50 = vrot.slane %v90_v21, %v2683_v41 }
 0x11f   :  { %2303 = vpow2.f32 %v1858_v58 }
 0x120   :  { %1949 = vmatprep.subr.bf16.mxu1 %v2743_v53 }
 0x128   :  { %v2697_v55 = vpop.eup %2301 }
 0x129   :  { %v227_v56 = vmul.f32 %v2697_v55, %v2300_v54  ;;  %v272_v54 = vld [vmem:[#allocation8 + $0xe0] sm:$0xff]  ;;  %v2304_v59 = vpop.eup %2303  ;;  %v226_v63 = vmul.f32 %v2697_v55, %v224_v61  ;;  %v380_v55 = vmul.f32 %v378_v51, %v2674_v36 }
 0x12a   :  { %v216_v62 = vadd.f32 1.0, %v2304_v59 }
 0x12b   :  { %229 = vrot.lane.b32.xlu1 %v227_v56, %s2543_s9  ;;  %v274_v56 = vld [vmem:[#allocation8 + $0xf0] sm:$0xff]  ;;  %v382_v29 = vadd.f32 %v380_v55, %v2681_v40 }
 0x12c   :  { %v2746_v57 = vpack.c.bf16 %v274_v56, %v272_v54  ;;  %2305 = vrcp.f32 %v216_v62 }
 0x12e   :  { %1951 = vmatpush1.bf16.msra.mxu1 %v2746_v57 }
 0x12f   :  { %2001 = vmatprep.subr.bf16.mxu1 %v2623_v5 }
 0x136   :  { %v2306_v7 = vpop.eup %2305 }
 0x19d   :  { %v230_v3 = vpop.permute.xlu1 %229 }
 0x19e   :  { %v2753_v4 = vadd.f32 %v230_v3, %v226_v63 }
 0x1a0   :  { %2307 = vtanh.f32 %v2753_v4 }
 0x1aa   :  { %v2308_v12 = vpop.eup %2307 }
 0x1ab   :  { %v234_v13 = vmul.f32 %v2308_v12, %v2306_v7 }
 0x1ad   :  { %236 = vrot.lane.b32.xlu1 %v234_v13, %s2543_s9 }
 0x21f   :  { %v237_v17 = vpop.permute.xlu1 %236 }
 0x220   :  { %v243_v20 = vsel %vm61_vm0, %v237_v17, %v241_v14  ;;  %1862 = vmatmul.mubr.msk.f32.vlgmr.msra.gmra.mrb[0].mxu0 %vm61_vm0, %v237_v17 }
 0x221   :  { %341 = vmatmul.mubr.f32.vlgmr.msra.gmra.mrb[2].mxu1 %v243_v20  ;;  %1971 = vmatpush1.bf16.msra.mxu0 %v2703_v1 }
 0x222   :  { %2003 = vmatpush1.bf16.msra.mxu1 %v2625_v9  ;;  %656 = vmatprep.mubr.f32.mxu1 %v2541_v0 }
 0x223   :  { %2005 = vmatprep.subr.bf16.mxu1 %v2627_v10  ;;  %1973 = vmatprep.subr.bf16.mxu0 %v2705_v2 }
 0x224   :  { %550 = vmatprep.mubr.f32.mxu0 %v2541_v0 }
 0x225   :  { %1975 = vmatpush1.bf16.msra.mxu0 %v2710_v8 }
 0x226   :  { %2007 = vmatpush1.bf16.msra.mxu1 %v2632_v15  ;;  %1977 = vmatprep.subr.bf16.mxu0 %v2713_v11 }
 0x227   :  { %2009 = vmatprep.subr.bf16.mxu1 %v2636_v16 }
 0x229   :  { %1979 = vmatpush1.bf16.msra.mxu0 %v2716_v18 }
 0x22a   :  { %2011 = vmatpush1.bf16.msra.mxu1 %v2643_v23  ;;  %1981 = vmatprep.subr.bf16.mxu0 %v2719_v19 }
 0x22b   :  { %2013 = vmatprep.subr.bf16.mxu1 %v2647_v24 }
 0x22d   :  { %1983 = vmatpush1.bf16.msra.mxu0 %v2722_v26 }
 0x22e   :  { %2015 = vmatpush1.bf16.msra.mxu1 %v2655_v28  ;;  %1985 = vmatprep.subr.bf16.mxu0 %v2725_v27 }
 0x22f   :  { %2017 = vmatprep.subr.bf16.mxu1 %v2701_v60 }
 0x231   :  { %1987 = vmatpush1.bf16.msra.mxu0 %v2728_v33 }
 0x232   :  { %1989 = vmatprep.subr.bf16.mxu0 %v2731_v35 }
 0x235   :  { %1991 = vmatpush1.bf16.msra.mxu0 %v2734_v43 }
 0x236   :  { %1993 = vmatprep.subr.bf16.mxu0 %v2737_v45 }
 0x239   :  { %1995 = vmatpush1.bf16.msra.mxu0 %v2740_v52 }
 0x23a   :  { %1997 = vmatprep.subr.bf16.mxu0 %v2743_v53 }
 0x23d   :  { %1999 = vmatpush1.bf16.msra.mxu0 %v2746_v57 }
 0x23e   :  { %2049 = vmatprep.subr.bf16.mxu0 %v2623_v5 }
 0x2f3   :  { %v452_v30 = vpop.f32.mrb[0].mxu0 }
 0x2f4   :  { %v457_v32 = vadd.f32 %v452_v30, %v382_v29  ;;  %v342_v37 = vpop.f32.mrb[2].mxu1  ;;  %v454_v38 = vpop.f32.mrb[1].mxu0 }
 0x2f5   :  { %v343_v39 = vadd.f32 %v342_v37, %v2792_v25  ;;  %v458_v42 = vadd.f32 %v454_v38, %v383_v31  ;;  %v344_v46 = vpop.f32.mrb[3].mxu1 }
 0x2f6   :  { %v1863_v47 = vmul.f32 -1.442695, %v457_v32  ;;  %v2801_v34 = vadd.f32 %v344_v46, %v2798_v50 }
 0x2f7   :  { %v1859_v48 = vmul.f32 -1.442695, %v343_v39  ;;  %v1864_v7 = vmul.f32 -1.442695, %v458_v42 }
 0x2f8   :  { %2309 = vpow2.f32 %v1863_v47 }
 0x2f9   :  { %2311 = vpow2.f32 %v1859_v48 }
 0x2fa   :  { %2313 = vtanh.f32 %v458_v42 }
 0x2fb   :  { %2315 = vtanh.f32 %v2801_v34 }
 0x302   :  { %v2310_v54 = vpop.eup %2309 }
 0x303   :  { %v2312_v56 = vpop.eup %2311  ;;  %v465_v58 = vadd.f32 1.0, %v2310_v54 }
 0x304   :  { %v353_v59 = vadd.f32 1.0, %v2312_v56  ;;  %v2314_v61 = vpop.eup %2313 }
 0x305   :  { %2317 = vrcp.f32 %v465_v58  ;;  %v2316_v62 = vpop.eup %2315 }
 0x306   :  { %2319 = vrcp.f32 %v353_v59 }
 0x307   :  { %2321 = vpow2.f32 %v1864_v7 }
 0x30f   :  { %v2318_v63 = vpop.eup %2317 }
 0x310   :  { %v2804_v3 = vpop.eup %2319  ;;  %v473_v6 = vmul.f32 %v2318_v63, %v2314_v61  ;;  %v472_v51 = vmul.f32 %v2318_v63, %v2753_v4  ;;  %v584_v4 = vpop.permute.xlu0 %583  ;;  %v1860_v61 = vmul.f32 -1.442695, %v2801_v34  ;;  %v1873_v34 = vld [vmem:[%s3112_s0 + $0x18] sm:$0xff] }
 0x311   :  { %v365_v41 = vmul.f32 %v2804_v3, %v2316_v62  ;;  %v2322_v12 = vpop.eup %2321  ;;  %v586_v29 = vmul.f32 %v584_v4, %v2674_v36  ;;  %v587_v39 = vmul.f32 %v584_v4, %v2687_v44 }
 0x312   :  { %475 = vrot.lane.b32.xlu1 %v473_v6, %s2543_s9  ;;  %v466_v13 = vadd.f32 1.0, %v2322_v12 }
 0x313   :  { %v588_v30 = vadd.f32 %v586_v29, %v2681_v40  ;;  %v589_v42 = vadd.f32 %v587_v39, %v2691_v49 }
 0x314   :  { %2323 = vrcp.f32 %v466_v13  ;;  %v362_v12 = vpop.permute.xlu0 %361 }
 0x31e   :  { %v2324_v20 = vpop.eup %2323 }
 0x384   :  { %v476_v14 = vpop.permute.xlu1 %475 }
 0x385   :  { %v478_v17 = vadd.f32 %v476_v14, %v472_v51 }
 0x387   :  { %2325 = vtanh.f32 %v478_v17 }
 0x391   :  { %v2326_v55 = vpop.eup %2325 }
 0x392   :  { %v480_v21 = vmul.f32 %v2326_v55, %v2324_v20  ;;  %v364_v20 = vmul.f32 %v2804_v3, %v362_v12 }
 0x394   :  { %482 = vrot.lane.b32.xlu1 %v480_v21, %s2543_s9 }
 0x406   :  { %v2810_v22 = vpop.permute.xlu1 %482 }
 0x407   :  { %1868 = vmatmul.mubr.msk.f32.vlgmr.msra.gmra.mrb[4].mxu1 %vm61_vm0, %v2810_v22 }
 0x408   :  { %2019 = vmatpush1.bf16.msra.mxu1 %v2703_v1  ;;  %756 = vmatprep.mubr.f32.mxu1 %v2541_v0 }
 0x409   :  { %2021 = vmatprep.subr.bf16.mxu1 %v2705_v2 }
 0x40c   :  { %2023 = vmatpush1.bf16.msra.mxu1 %v2710_v8 }
 0x40d   :  { %2025 = vmatprep.subr.bf16.mxu1 %v2713_v11 }
 0x410   :  { %2027 = vmatpush1.bf16.msra.mxu1 %v2716_v18 }
 0x411   :  { %2029 = vmatprep.subr.bf16.mxu1 %v2719_v19 }
 0x414   :  { %2031 = vmatpush1.bf16.msra.mxu1 %v2722_v26 }
 0x415   :  { %2033 = vmatprep.subr.bf16.mxu1 %v2725_v27 }
 0x418   :  { %2035 = vmatpush1.bf16.msra.mxu1 %v2728_v33 }
 0x419   :  { %2037 = vmatprep.subr.bf16.mxu1 %v2731_v35 }
 0x41c   :  { %2039 = vmatpush1.bf16.msra.mxu1 %v2734_v43 }
 0x41d   :  { %2041 = vmatprep.subr.bf16.mxu1 %v2737_v45 }
 0x420   :  { %2043 = vmatpush1.bf16.msra.mxu1 %v2740_v52 }
 0x421   :  { %2045 = vmatprep.subr.bf16.mxu1 %v2743_v53 }
 0x424   :  { %2047 = vmatpush1.bf16.msra.mxu1 %v2746_v57 }
 0x425   :  { %2097 = vmatprep.subr.bf16.mxu1 %v2623_v5 }
 0x4da   :  { %v658_v31 = vpop.f32.mrb[4].mxu1 }
 0x4db   :  { %v663_v32 = vadd.f32 %v658_v31, %v588_v30  ;;  %v660_v37 = vpop.f32.mrb[5].mxu1 }
 0x4dc   :  { %v664_v46 = vadd.f32 %v660_v37, %v589_v42 }
 0x4dd   :  { %v1869_v38 = vmul.f32 -1.442695, %v663_v32 }
 0x4de   :  { %v1870_v59 = vmul.f32 -1.442695, %v664_v46 }
 0x4df   :  { %2327 = vpow2.f32 %v1869_v38 }
 0x4e0   :  { %2329 = vtanh.f32 %v664_v46 }
 0x4e9   :  { %v2328_v47 = vpop.eup %2327 }
 0x4ea   :  { %v671_v48 = vadd.f32 1.0, %v2328_v47  ;;  %v2330_v54 = vpop.eup %2329 }
 0x4ec   :  { %2331 = vrcp.f32 %v671_v48 }
 0x4ed   :  { %2333 = vpow2.f32 %v1870_v59 }
 0x4ee   :  { %2335 = vpow2.f32 %v1860_v61 }
 0x4f6   :  { %v2332_v56 = vpop.eup %2331 }
 0x4f7   :  { %v679_v58 = vmul.f32 %v2332_v56, %v2330_v54  ;;  %v2334_v62 = vpop.eup %2333  ;;  %v678_v7 = vmul.f32 %v2332_v56, %v478_v17 }
 0x4f8   :  { %v672_v63 = vadd.f32 1.0, %v2334_v62  ;;  %v2336_v6 = vpop.eup %2335 }
 0x4f9   :  { %681 = vrot.lane.b32.xlu1 %v679_v58, %s2543_s9  ;;  %v354_v14 = vadd.f32 1.0, %v2336_v6 }
 0x4fa   :  { %2337 = vrcp.f32 %v672_v63 }
 0x4fd   :  { %367 = vrot.lane.b32.xlu1 %v365_v41, %s2543_s9 }
 0x501   :  { %789 = vperm.xlu1 %2296, %v1873_v34  }
 0x504   :  { %v2338_v17 = vpop.eup %2337 }
 0x56b   :  { %v682_v13 = vpop.permute.xlu1 %681 }
 0x56c   :  { %v2838_v51 = vadd.f32 %v682_v13, %v678_v7 }
 0x56e   :  { %2339 = vtanh.f32 %v2838_v51 }
 0x56f   :  { %v368_v41 = vpop.permute.xlu1 %367  ;;  %2341 = vrcp.f32 %v354_v14 }
 0x570   :  { %v2845_v55 = vadd.f32 %v368_v41, %v364_v20 }
 0x572   :  { %2343 = vtanh.f32 %v2845_v55 }
 0x578   :  { %v2340_v21 = vpop.eup %2339 }
 0x579   :  { %v686_v4 = vmul.f32 %v2340_v21, %v2338_v17  ;;  %v2342_v29 = vpop.eup %2341 }
 0x57b   :  { %688 = vrot.lane.b32.xlu0 %v686_v4, %s2543_s9 }
 0x57c   :  { %v2344_v3 = vpop.eup %2343 }
 0x57d   :  { %v372_v30 = vmul.f32 %v2344_v3, %v2342_v29  ;;  %v1879_v3 = vld [vmem:[%s3112_s0 + $0x20] sm:$0xff] }
 0x57f   :  { %v485_v31 = vsel %vm61_vm0, %v2810_v22, %v372_v30 }
 0x580   :  { %551 = vmatmul.mubr.f32.vlgmr.msra.gmra.mrb[2].mxu0 %v485_v31  ;;  %v790_v58 = vpop.permute.xlu1 %789 }
 0x581   :  { %2051 = vmatpush1.bf16.msra.mxu0 %v2625_v9  ;;  %862 = vmatprep.mubr.f32.mxu0 %v2541_v0  ;;  %v792_v59 = vmul.f32 %v790_v58, %v2674_v36  ;;  %v793_v12 = vmul.f32 %v790_v58, %v2687_v44 }
 0x582   :  { %2053 = vmatprep.subr.bf16.mxu0 %v2627_v10 }
 0x583   :  { %v794_v61 = vadd.f32 %v792_v59, %v2681_v40  ;;  %v795_v13 = vadd.f32 %v793_v12, %v2691_v49 }
 0x585   :  { %2055 = vmatpush1.bf16.msra.mxu0 %v2632_v15 }
 0x586   :  { %2057 = vmatprep.subr.bf16.mxu0 %v2636_v16 }
 0x589   :  { %2059 = vmatpush1.bf16.msra.mxu0 %v2643_v23 }
 0x58a   :  { %2061 = vmatprep.subr.bf16.mxu0 %v2647_v24 }
 0x58d   :  { %2063 = vmatpush1.bf16.msra.mxu0 %v2655_v28 }
 0x58e   :  { %2065 = vmatprep.subr.bf16.mxu0 %v2701_v60 }
 0x5ed   :  { %v2860_v22 = vpop.permute.xlu0 %688 }
 0x5ee   :  { %1874 = vmatmul.mubr.msk.f32.vlgmr.msra.gmra.mrb[4].mxu0 %vm61_vm0, %v2860_v22 }
 0x5ef   :  { %2067 = vmatpush1.bf16.msra.mxu0 %v2703_v1  ;;  %962 = vmatprep.mubr.f32.mxu0 %v2541_v0 }
 0x5f0   :  { %2069 = vmatprep.subr.bf16.mxu0 %v2705_v2 }
 0x5f3   :  { %2071 = vmatpush1.bf16.msra.mxu0 %v2710_v8 }
 0x5f4   :  { %2073 = vmatprep.subr.bf16.mxu0 %v2713_v11 }
 0x5f7   :  { %2075 = vmatpush1.bf16.msra.mxu0 %v2716_v18 }
 0x5f8   :  { %2077 = vmatprep.subr.bf16.mxu0 %v2719_v19 }
 0x5fb   :  { %2079 = vmatpush1.bf16.msra.mxu0 %v2722_v26 }
 0x5fc   :  { %2081 = vmatprep.subr.bf16.mxu0 %v2725_v27 }
 0x5ff   :  { %2083 = vmatpush1.bf16.msra.mxu0 %v2728_v33 }
 0x600   :  { %2085 = vmatprep.subr.bf16.mxu0 %v2731_v35 }
 0x603   :  { %2087 = vmatpush1.bf16.msra.mxu0 %v2734_v43 }
 0x604   :  { %2089 = vmatprep.subr.bf16.mxu0 %v2737_v45 }
 0x607   :  { %2091 = vmatpush1.bf16.msra.mxu0 %v2740_v52 }
 0x608   :  { %2093 = vmatprep.subr.bf16.mxu0 %v2743_v53 }
 0x60b   :  { %2095 = vmatpush1.bf16.msra.mxu0 %v2746_v57 }
 0x60c   :  { %2145 = vmatprep.subr.bf16.mxu0 %v2623_v5 }
 0x653   :  { %v552_v32 = vpop.f32.mrb[2].mxu0 }
 0x654   :  { %v553_v37 = vadd.f32 %v552_v32, %v2792_v25  ;;  %v554_v38 = vpop.f32.mrb[3].mxu0 }
 0x655   :  { %v555_v42 = vadd.f32 %v554_v38, %v2798_v50 }
 0x656   :  { %v1865_v39 = vmul.f32 -1.442695, %v553_v37 }
 0x657   :  { %v1866_v34 = vmul.f32 -1.442695, %v555_v42 }
 0x658   :  { %2345 = vpow2.f32 %v1865_v39 }
 0x659   :  { %2347 = vtanh.f32 %v555_v42 }
 0x662   :  { %v2346_v46 = vpop.eup %2345 }
 0x663   :  { %v563_v47 = vadd.f32 1.0, %v2346_v46  ;;  %v2348_v48 = vpop.eup %2347 }
 0x665   :  { %2349 = vrcp.f32 %v563_v47 }
 0x66f   :  { %v2350_v54 = vpop.eup %2349 }
 0x670   :  { %v571_v56 = vmul.f32 %v2350_v54, %v2348_v48  ;;  %v570_v31 = vmul.f32 %v2350_v54, %v2845_v55 }
 0x672   :  { %573 = vrot.lane.b32.xlu0 %v571_v56, %s2543_s9 }
 0x6c1   :  { %v864_v62 = vpop.f32.mrb[4].mxu0 }
 0x6c2   :  { %v869_v63 = vadd.f32 %v864_v62, %v794_v61  ;;  %v866_v6 = vpop.f32.mrb[5].mxu0 }
 0x6c3   :  { %v870_v14 = vadd.f32 %v866_v6, %v795_v13 }
 0x6c4   :  { %v1875_v7 = vmul.f32 -1.442695, %v869_v63 }
 0x6c5   :  { %v1876_v55 = vmul.f32 -1.442695, %v870_v14 }
 0x6c6   :  { %2351 = vpow2.f32 %v1875_v7 }
 0x6c7   :  { %2353 = vtanh.f32 %v870_v14 }
 0x6d0   :  { %v2352_v20 = vpop.eup %2351 }
 0x6d1   :  { %v877_v41 = vadd.f32 1.0, %v2352_v20  ;;  %v2354_v17 = vpop.eup %2353 }
 0x6d3   :  { %2355 = vrcp.f32 %v877_v41 }
 0x6d4   :  { %2357 = vpow2.f32 %v1866_v34 }
 0x6dd   :  { %v2356_v21 = vpop.eup %2355 }
 0x6de   :  { %v885_v4 = vmul.f32 %v2356_v21, %v2354_v17  ;;  %v2358_v29 = vpop.eup %2357  ;;  %v884_v48 = vmul.f32 %v2356_v21, %v2838_v51 }
 0x6df   :  { %v564_v30 = vadd.f32 1.0, %v2358_v29 }
 0x6e0   :  { %887 = vrot.lane.b32.xlu1 %v885_v4, %s2543_s9 }
 0x6e1   :  { %2359 = vrcp.f32 %v564_v30 }
 0x6e4   :  { %995 = vperm.xlu1 %2296, %v1879_v3   ;;  %v574_v32 = vpop.permute.xlu0 %573 }
 0x6e5   :  { %v2893_v37 = vadd.f32 %v574_v32, %v570_v31 }
 0x6e7   :  { %2361 = vtanh.f32 %v2893_v37 }
 0x6e8   :  { %2363 = vpow2.f32 %v1876_v55 }
 0x6eb   :  { %v2360_v38 = vpop.eup %2359 }
 0x6f1   :  { %v2362_v39 = vpop.eup %2361 }
 0x6f2   :  { %v578_v42 = vmul.f32 %v2362_v39, %v2360_v38 }
 0x6f4   :  { %v691_v46 = vsel %vm61_vm0, %v2860_v22, %v578_v42  ;;  %v2364_v22 = vpop.eup %2363 }
 0x6f5   :  { %757 = vmatmul.mubr.f32.vlgmr.msra.gmra.mrb[6].mxu1 %v691_v46  ;;  %v878_v47 = vadd.f32 1.0, %v2364_v22 }
 0x6f6   :  { %2099 = vmatpush1.bf16.msra.mxu1 %v2625_v9  ;;  %1068 = vmatprep.mubr.f32.mxu1 %v2541_v0 }
 0x6f7   :  { %2101 = vmatprep.subr.bf16.mxu1 %v2627_v10  ;;  %2365 = vrcp.f32 %v878_v47 }
 0x6fa   :  { %2103 = vmatpush1.bf16.msra.mxu1 %v2632_v15 }
 0x6fb   :  { %2105 = vmatprep.subr.bf16.mxu1 %v2636_v16 }
 0x6fe   :  { %2107 = vmatpush1.bf16.msra.mxu1 %v2643_v23 }
 0x6ff   :  { %2109 = vmatprep.subr.bf16.mxu1 %v2647_v24 }
 0x701   :  { %v2366_v58 = vpop.eup %2365 }
 0x702   :  { %2111 = vmatpush1.bf16.msra.mxu1 %v2655_v28 }
 0x703   :  { %2113 = vmatprep.subr.bf16.mxu1 %v2701_v60 }
 0x752   :  { %v888_v54 = vpop.permute.xlu1 %887 }
 0x753   :  { %v2908_v56 = vadd.f32 %v888_v54, %v884_v48 }
 0x755   :  { %2367 = vtanh.f32 %v2908_v56 }
 0x75f   :  { %v2368_v59 = vpop.eup %2367 }
 0x760   :  { %v892_v61 = vmul.f32 %v2368_v59, %v2366_v58 }
 0x762   :  { %894 = vrot.lane.b32.xlu0 %v892_v61, %s2543_s9 }
 0x7c8   :  { %v758_v62 = vpop.f32.mrb[6].mxu1 }
 0x7c9   :  { %v759_v63 = vadd.f32 %v758_v62, %v2792_v25  ;;  %v760_v6 = vpop.f32.mrb[7].mxu1 }
 0x7ca   :  { %v761_v51 = vadd.f32 %v760_v6, %v2798_v50 }
 0x7cb   :  { %v1871_v7 = vmul.f32 -1.442695, %v759_v63 }
 0x7cc   :  { %v1872_v17 = vmul.f32 -1.442695, %v761_v51 }
 0x7cd   :  { %2369 = vpow2.f32 %v1871_v7 }
 0x7ce   :  { %2371 = vtanh.f32 %v761_v51 }
 0x7d4   :  { %v895_v12 = vpop.permute.xlu0 %894 }
 0x7d5   :  { %1880 = vmatmul.mubr.msk.f32.vlgmr.msra.gmra.mrb[8].mxu1 %vm61_vm0, %v895_v12 }
 0x7d6   :  { %2115 = vmatpush1.bf16.msra.mxu1 %v2703_v1  ;;  %1168 = vmatprep.mubr.f32.mxu1 %v2541_v0 }
 0x7d7   :  { %v2370_v13 = vpop.eup %2369  ;;  %2117 = vmatprep.subr.bf16.mxu1 %v2705_v2 }
 0x7d8   :  { %v769_v14 = vadd.f32 1.0, %v2370_v13  ;;  %v2372_v20 = vpop.eup %2371 }
 0x7da   :  { %2373 = vrcp.f32 %v769_v14  ;;  %2119 = vmatpush1.bf16.msra.mxu1 %v2710_v8 }
 0x7db   :  { %2121 = vmatprep.subr.bf16.mxu1 %v2713_v11  ;;  %2375 = vpow2.f32 %v1872_v17 }
 0x7de   :  { %2123 = vmatpush1.bf16.msra.mxu1 %v2716_v18 }
 0x7df   :  { %2125 = vmatprep.subr.bf16.mxu1 %v2719_v19 }
 0x7e2   :  { %2127 = vmatpush1.bf16.msra.mxu1 %v2722_v26 }
 0x7e3   :  { %2129 = vmatprep.subr.bf16.mxu1 %v2725_v27 }
 0x7e4   :  { %v2374_v34 = vpop.eup %2373 }
 0x7e5   :  { %v777_v41 = vmul.f32 %v2374_v34, %v2372_v20  ;;  %v2376_v21 = vpop.eup %2375  ;;  %v776_v29 = vmul.f32 %v2374_v34, %v2893_v37  ;;  %v996_v37 = vpop.permute.xlu1 %995 }
 0x7e6   :  { %2131 = vmatpush1.bf16.msra.mxu1 %v2728_v33  ;;  %v770_v4 = vadd.f32 1.0, %v2376_v21  ;;  %v998_v42 = vmul.f32 %v996_v37, %v2674_v36  ;;  %v999_v54 = vmul.f32 %v996_v37, %v2687_v44 }
 0x7e7   :  { %779 = vrot.lane.b32.xlu0 %v777_v41, %s2543_s9  ;;  %2133 = vmatprep.subr.bf16.mxu1 %v2731_v35 }
 0x7e8   :  { %2377 = vrcp.f32 %v770_v4  ;;  %v1000_v46 = vadd.f32 %v998_v42, %v2681_v40  ;;  %v1001_v58 = vadd.f32 %v999_v54, %v2691_v49 }
 0x7ea   :  { %2135 = vmatpush1.bf16.msra.mxu1 %v2734_v43 }
 0x7eb   :  { %2137 = vmatprep.subr.bf16.mxu1 %v2737_v45 }
 0x7ee   :  { %2139 = vmatpush1.bf16.msra.mxu1 %v2740_v52 }
 0x7ef   :  { %2141 = vmatprep.subr.bf16.mxu1 %v2743_v53 }
 0x7f2   :  { %2143 = vmatpush1.bf16.msra.mxu1 %v2746_v57  ;;  %v2378_v31 = vpop.eup %2377 }
 0x7f3   :  { %2193 = vmatprep.subr.bf16.mxu1 %v2623_v5 }
 0x859   :  { %v780_v3 = vpop.permute.xlu0 %779 }
 0x85a   :  { %v2934_v30 = vadd.f32 %v780_v3, %v776_v29 }
 0x85c   :  { %2379 = vtanh.f32 %v2934_v30 }
 0x866   :  { %v2380_v32 = vpop.eup %2379 }
 0x867   :  { %v784_v38 = vmul.f32 %v2380_v32, %v2378_v31 }
 0x869   :  { %v897_v39 = vsel %vm61_vm0, %v895_v12, %v784_v38 }
 0x86a   :  { %963 = vmatmul.mubr.f32.vlgmr.msra.gmra.mrb[6].mxu0 %v897_v39 }
 0x86b   :  { %2147 = vmatpush1.bf16.msra.mxu0 %v2625_v9  ;;  %1274 = vmatprep.mubr.f32.mxu0 %v2541_v0 }
 0x86c   :  { %2149 = vmatprep.subr.bf16.mxu0 %v2627_v10 }
 0x86f   :  { %2151 = vmatpush1.bf16.msra.mxu0 %v2632_v15 }
 0x870   :  { %2153 = vmatprep.subr.bf16.mxu0 %v2636_v16 }
 0x873   :  { %2155 = vmatpush1.bf16.msra.mxu0 %v2643_v23 }
 0x874   :  { %2157 = vmatprep.subr.bf16.mxu0 %v2647_v24 }
 0x877   :  { %2159 = vmatpush1.bf16.msra.mxu0 %v2655_v28 }
 0x878   :  { %2161 = vmatprep.subr.bf16.mxu0 %v2701_v60 }
 0x8a8   :  { %v1070_v55 = vpop.f32.mrb[8].mxu1 }
 0x8a9   :  { %v1075_v22 = vadd.f32 %v1070_v55, %v1000_v46  ;;  %v1072_v47 = vpop.f32.mrb[9].mxu1 }
 0x8aa   :  { %v1076_v59 = vadd.f32 %v1072_v47, %v1001_v58 }
 0x8ab   :  { %v1881_v48 = vmul.f32 -1.442695, %v1075_v22 }
 0x8ac   :  { %v1882_v12 = vmul.f32 -1.442695, %v1076_v59 }
 0x8ad   :  { %2381 = vpow2.f32 %v1881_v48 }
 0x8ae   :  { %2383 = vtanh.f32 %v1076_v59 }
 0x8b7   :  { %v2382_v61 = vpop.eup %2381 }
 0x8b8   :  { %v1083_v62 = vadd.f32 1.0, %v2382_v61  ;;  %v2384_v63 = vpop.eup %2383 }
 0x8ba   :  { %2385 = vrcp.f32 %v1083_v62 }
 0x8bb   :  { %2387 = vpow2.f32 %v1882_v12 }
 0x8c4   :  { %v2386_v6 = vpop.eup %2385 }
 0x8c5   :  { %v1091_v7 = vmul.f32 %v2386_v6, %v2384_v63  ;;  %v2388_v51 = vpop.eup %2387  ;;  %v1090_v14 = vmul.f32 %v2386_v6, %v2908_v56  ;;  %v1885_v56 = vld [vmem:[%s3112_s0 + $0x28] sm:$0xff] }
 0x8c6   :  { %v1084_v13 = vadd.f32 1.0, %v2388_v51 }
 0x8c7   :  { %1093 = vrot.lane.b32.xlu1 %v1091_v7, %s2543_s9 }
 0x8c8   :  { %2389 = vrcp.f32 %v1084_v13 }
 0x8d2   :  { %v2390_v29 = vpop.eup %2389 }
 0x939   :  { %v1094_v20 = vpop.permute.xlu1 %1093 }
 0x93a   :  { %v2953_v34 = vadd.f32 %v1094_v20, %v1090_v14 }
 0x93c   :  { %2391 = vtanh.f32 %v2953_v34 }
 0x93d   :  { %v964_v41 = vpop.f32.mrb[6].mxu0 }
 0x93e   :  { %v965_v17 = vadd.f32 %v964_v41, %v2792_v25  ;;  %v966_v21 = vpop.f32.mrb[7].mxu0 }
 0x93f   :  { %v967_v32 = vadd.f32 %v966_v21, %v2798_v50 }
 0x940   :  { %v1877_v4 = vmul.f32 -1.442695, %v965_v17 }
 0x941   :  { %v1878_v55 = vmul.f32 -1.442695, %v967_v32 }
 0x942   :  { %2393 = vpow2.f32 %v1877_v4 }
 0x943   :  { %2395 = vtanh.f32 %v967_v32 }
 0x946   :  { %v2392_v3 = vpop.eup %2391 }
 0x947   :  { %v1098_v31 = vmul.f32 %v2392_v3, %v2390_v29 }
 0x949   :  { %1100 = vrot.lane.b32.xlu0 %v1098_v31, %s2543_s9 }
 0x94c   :  { %v2394_v38 = vpop.eup %2393 }
 0x94d   :  { %v975_v39 = vadd.f32 1.0, %v2394_v38  ;;  %1201 = vperm.xlu0 %2295, %v1885_v56   ;;  %v2396_v37 = vpop.eup %2395 }
 0x94f   :  { %2397 = vrcp.f32 %v975_v39 }
 0x950   :  { %2399 = vpow2.f32 %v1878_v55 }
 0x959   :  { %v2398_v42 = vpop.eup %2397 }
 0x95a   :  { %v983_v46 = vmul.f32 %v2398_v42, %v2396_v37  ;;  %v2400_v47 = vpop.eup %2399  ;;  %v982_v54 = vmul.f32 %v2398_v42, %v2934_v30 }
 0x95b   :  { %v976_v48 = vadd.f32 1.0, %v2400_v47 }
 0x95c   :  { %985 = vrot.lane.b32.xlu1 %v983_v46, %s2543_s9 }
 0x95d   :  { %2401 = vrcp.f32 %v976_v48 }
 0x967   :  { %v2402_v30 = vpop.eup %2401 }
 0x9bb   :  { %v1101_v22 = vpop.permute.xlu0 %1100 }
 0x9bc   :  { %1886 = vmatmul.mubr.msk.f32.vlgmr.msra.gmra.mrb[8].mxu0 %vm61_vm0, %v1101_v22 }
 0x9bd   :  { %2163 = vmatpush1.bf16.msra.mxu0 %v2703_v1  ;;  %1374 = vmatprep.mubr.f32.mxu0 %v2541_v0 }
 0x9be   :  { %2165 = vmatprep.subr.bf16.mxu0 %v2705_v2 }
 0x9c1   :  { %2167 = vmatpush1.bf16.msra.mxu0 %v2710_v8 }
 0x9c2   :  { %2169 = vmatprep.subr.bf16.mxu0 %v2713_v11 }
 0x9c5   :  { %2171 = vmatpush1.bf16.msra.mxu0 %v2716_v18 }
 0x9c6   :  { %2173 = vmatprep.subr.bf16.mxu0 %v2719_v19 }
 0x9c9   :  { %2175 = vmatpush1.bf16.msra.mxu0 %v2722_v26 }
 0x9ca   :  { %2177 = vmatprep.subr.bf16.mxu0 %v2725_v27 }
 0x9cd   :  { %2179 = vmatpush1.bf16.msra.mxu0 %v2728_v33 }
 0x9ce   :  { %v986_v58 = vpop.permute.xlu1 %985  ;;  %2181 = vmatprep.subr.bf16.mxu0 %v2731_v35 }
 0x9cf   :  { %v2976_v59 = vadd.f32 %v986_v58, %v982_v54 }
 0x9d1   :  { %2403 = vtanh.f32 %v2976_v59  ;;  %2183 = vmatpush1.bf16.msra.mxu0 %v2734_v43 }
 0x9d2   :  { %2185 = vmatprep.subr.bf16.mxu0 %v2737_v45 }
 0x9d5   :  { %2187 = vmatpush1.bf16.msra.mxu0 %v2740_v52 }
 0x9d6   :  { %2189 = vmatprep.subr.bf16.mxu0 %v2743_v53 }
 0x9d9   :  { %2191 = vmatpush1.bf16.msra.mxu0 %v2746_v57 }
 0x9da   :  { %2241 = vmatprep.subr.bf16.mxu0 %v2623_v5  ;;  %v1202_v5 = vpop.permute.xlu0 %1201 }
 0x9db   :  { %v2404_v61 = vpop.eup %2403  ;;  %v1204_v6 = vmul.f32 %v1202_v5, %v2674_v36  ;;  %v1205_v20 = vmul.f32 %v1202_v5, %v2687_v44 }
 0x9dc   :  { %v990_v62 = vmul.f32 %v2404_v61, %v2402_v30 }
 0x9dd   :  { %v1206_v7 = vadd.f32 %v1204_v6, %v2681_v40  ;;  %v1207_v41 = vadd.f32 %v1205_v20, %v2691_v49 }
 0x9de   :  { %v1103_v63 = vsel %vm61_vm0, %v1101_v22, %v990_v62 }
 0x9df   :  { %1169 = vmatmul.mubr.f32.vlgmr.msra.gmra.mrb[10].mxu1 %v1103_v63 }
 0x9e0   :  { %2195 = vmatpush1.bf16.msra.mxu1 %v2625_v9  ;;  %1480 = vmatprep.mubr.f32.mxu1 %v2541_v0 }
 0x9e1   :  { %2197 = vmatprep.subr.bf16.mxu1 %v2627_v10 }
 0x9e4   :  { %2199 = vmatpush1.bf16.msra.mxu1 %v2632_v15 }
 0x9e5   :  { %2201 = vmatprep.subr.bf16.mxu1 %v2636_v16 }
 0x9e8   :  { %2203 = vmatpush1.bf16.msra.mxu1 %v2643_v23 }
 0x9e9   :  { %2205 = vmatprep.subr.bf16.mxu1 %v2647_v24 }
 0x9ec   :  { %2207 = vmatpush1.bf16.msra.mxu1 %v2655_v28 }
 0x9ed   :  { %2209 = vmatprep.subr.bf16.mxu1 %v2701_v60 }
 0xa8f   :  { %v1276_v12 = vpop.f32.mrb[8].mxu0 }
 0xa90   :  { %v1281_v51 = vadd.f32 %v1276_v12, %v1206_v7  ;;  %v1278_v13 = vpop.f32.mrb[9].mxu0  ;;  %v1891_v7 = vld [vmem:[%s3112_s0 + $0x30] sm:$0xff] }
 0xa91   :  { %v1282_v17 = vadd.f32 %v1278_v13, %v1207_v41 }
 0xa92   :  { %v1887_v14 = vmul.f32 -1.442695, %v1281_v51 }
 0xa93   :  { %v1888_v48 = vmul.f32 -1.442695, %v1282_v17 }
 0xa94   :  { %2405 = vpow2.f32 %v1887_v14 }
 0xa95   :  { %2407 = vtanh.f32 %v1282_v17 }
 0xa9e   :  { %v2406_v21 = vpop.eup %2405 }
 0xa9f   :  { %v1289_v4 = vadd.f32 1.0, %v2406_v21  ;;  %v2408_v29 = vpop.eup %2407 }
 0xaa1   :  { %2409 = vrcp.f32 %v1289_v4 }
 0xaab   :  { %v2410_v3 = vpop.eup %2409 }
 0xaac   :  { %v1297_v31 = vmul.f32 %v2410_v3, %v2408_v29  ;;  %v1296_v30 = vmul.f32 %v2410_v3, %v2953_v34 }
 0xaae   :  { %1299 = vrot.lane.b32.xlu1 %v1297_v31, %s2543_s9 }
 0xab2   :  { %v1170_v32 = vpop.f32.mrb[10].mxu1 }
 0xab3   :  { %v1171_v56 = vadd.f32 %v1170_v32, %v2792_v25  ;;  %v1172_v38 = vpop.f32.mrb[11].mxu1 }
 0xab4   :  { %v1173_v37 = vadd.f32 %v1172_v38, %v2798_v50 }
 0xab5   :  { %v1883_v39 = vmul.f32 -1.442695, %v1171_v56 }
 0xab6   :  { %v1884_v12 = vmul.f32 -1.442695, %v1173_v37 }
 0xab7   :  { %2411 = vpow2.f32 %v1883_v39 }
 0xab8   :  { %2413 = vtanh.f32 %v1173_v37 }
 0xac1   :  { %v2412_v42 = vpop.eup %2411 }
 0xac2   :  { %v1181_v46 = vadd.f32 1.0, %v2412_v42  ;;  %v2414_v55 = vpop.eup %2413 }
 0xac4   :  { %2415 = vrcp.f32 %v1181_v46 }
 0xac5   :  { %2417 = vpow2.f32 %v1888_v48 }
 0xace   :  { %v2416_v22 = vpop.eup %2415 }
 0xacf   :  { %v1189_v47 = vmul.f32 %v2416_v22, %v2414_v55  ;;  %v2418_v54 = vpop.eup %2417  ;;  %v1188_v34 = vmul.f32 %v2416_v22, %v2976_v59 }
 0xad0   :  { %v1290_v58 = vadd.f32 1.0, %v2418_v54 }
 0xad1   :  { %1191 = vrot.lane.b32.xlu1 %v1189_v47, %s2543_s9 }
 0xad2   :  { %2419 = vrcp.f32 %v1290_v58 }
 0xadc   :  { %v2420_v63 = vpop.eup %2419 }
 0xb20   :  { %v1300_v61 = vpop.permute.xlu1 %1299 }
 0xb21   :  { %v3004_v62 = vadd.f32 %v1300_v61, %v1296_v30 }
 0xb23   :  { %2421 = vtanh.f32 %v3004_v62 }
 0xb24   :  { %2423 = vpow2.f32 %v1884_v12 }
 0xb2d   :  { %v2422_v5 = vpop.eup %2421 }
 0xb2e   :  { %v1304_v6 = vmul.f32 %v2422_v5, %v2420_v63  ;;  %v2424_v13 = vpop.eup %2423 }
 0xb2f   :  { %v1182_v20 = vadd.f32 1.0, %v2424_v13 }
 0xb30   :  { %1306 = vrot.lane.b32.xlu0 %v1304_v6, %s2543_s9 }
 0xb34   :  { %1407 = vperm.xlu0 %2295, %v1891_v7  }
 0xb43   :  { %v1192_v51 = vpop.permute.xlu1 %1191 }
 0xb44   :  { %v3012_v14 = vadd.f32 %v1192_v51, %v1188_v34 }
 0xb46   :  { %2425 = vtanh.f32 %v3012_v14 }
 0xb47   :  { %2427 = vrcp.f32 %v1182_v20  ;;  %v1897_v20 = vld [vmem:[%s3112_s0 + $0x38] sm:$0xff] }
 0xb50   :  { %v2426_v41 = vpop.eup %2425 }
 0xb51   :  { %v2428_v17 = vpop.eup %2427 }
 0xb52   :  { %v1196_v21 = vmul.f32 %v2428_v17, %v2426_v41 }
 0xba2   :  { %v1307_v4 = vpop.permute.xlu0 %1306 }
 0xba3   :  { %v1309_v29 = vsel %vm61_vm0, %v1307_v4, %v1196_v21  ;;  %1892 = vmatmul.mubr.msk.f32.vlgmr.msra.gmra.mrb[12].mxu1 %vm61_vm0, %v1307_v4 }
 0xba4   :  { %1375 = vmatmul.mubr.f32.vlgmr.msra.gmra.mrb[10].mxu0 %v1309_v29  ;;  %2211 = vmatpush1.bf16.msra.mxu1 %v2703_v1 }
 0xba5   :  { %2213 = vmatprep.subr.bf16.mxu1 %v2705_v2  ;;  %2243 = vmatpush1.bf16.msra.mxu0 %v2625_v9 }
 0xba6   :  { %2245 = vmatprep.subr.bf16.mxu0 %v2627_v10  ;;  %1686 = vmatprep.mubr.f32.mxu0 %v2541_v0 }
 0xba7   :  { %1580 = vmatprep.mubr.f32.mxu1 %v2541_v0 }
 0xba8   :  { %2215 = vmatpush1.bf16.msra.mxu1 %v2710_v8 }
 0xba9   :  { %2217 = vmatprep.subr.bf16.mxu1 %v2713_v11  ;;  %2247 = vmatpush1.bf16.msra.mxu0 %v2632_v15 }
 0xbaa   :  { %2249 = vmatprep.subr.bf16.mxu0 %v2636_v16 }
 0xbac   :  { %2219 = vmatpush1.bf16.msra.mxu1 %v2716_v18 }
 0xbad   :  { %2221 = vmatprep.subr.bf16.mxu1 %v2719_v19  ;;  %2251 = vmatpush1.bf16.msra.mxu0 %v2643_v23 }
 0xbae   :  { %2253 = vmatprep.subr.bf16.mxu0 %v2647_v24 }
 0xbb0   :  { %2223 = vmatpush1.bf16.msra.mxu1 %v2722_v26 }
 0xbb1   :  { %2225 = vmatprep.subr.bf16.mxu1 %v2725_v27  ;;  %2255 = vmatpush1.bf16.msra.mxu0 %v2655_v28 }
 0xbb2   :  { %2257 = vmatprep.subr.bf16.mxu0 %v2701_v60 }
 0xbb3   :  { %v1408_v9 = vpop.permute.xlu0 %1407 }
 0xbb4   :  { %2227 = vmatpush1.bf16.msra.mxu1 %v2728_v33  ;;  %v1410_v10 = vmul.f32 %v1408_v9, %v2674_v36  ;;  %v1411_v32 = vmul.f32 %v1408_v9, %v2687_v44 }
 0xbb5   :  { %2229 = vmatprep.subr.bf16.mxu1 %v2731_v35 }
 0xbb6   :  { %v1412_v15 = vadd.f32 %v1410_v10, %v2681_v40  ;;  %v1413_v56 = vadd.f32 %v1411_v32, %v2691_v49 }
 0xbb8   :  { %2231 = vmatpush1.bf16.msra.mxu1 %v2734_v43 }
 0xbb9   :  { %2233 = vmatprep.subr.bf16.mxu1 %v2737_v45 }
 0xbbc   :  { %2235 = vmatpush1.bf16.msra.mxu1 %v2740_v52 }
 0xbbd   :  { %2237 = vmatprep.subr.bf16.mxu1 %v2743_v53 }
 0xbc0   :  { %2239 = vmatpush1.bf16.msra.mxu1 %v2746_v57 }
 0xc76   :  { %v1482_v16 = vpop.f32.mrb[12].mxu1 }
 0xc77   :  { %v1487_v23 = vadd.f32 %v1482_v16, %v1412_v15  ;;  %v1376_v24 = vpop.f32.mrb[10].mxu0  ;;  %v1484_v28 = vpop.f32.mrb[13].mxu1 }
 0xc78   :  { %v1377_v60 = vadd.f32 %v1376_v24, %v2792_v25  ;;  %v1378_v59 = vpop.f32.mrb[11].mxu0  ;;  %v1488_v38 = vadd.f32 %v1484_v28, %v1413_v56 }
 0xc79   :  { %v1893_v3 = vmul.f32 -1.442695, %v1487_v23  ;;  %v1379_v39 = vadd.f32 %v1378_v59, %v2798_v50 }
 0xc7a   :  { %v1889_v31 = vmul.f32 -1.442695, %v1377_v60  ;;  %v1894_v61 = vmul.f32 -1.442695, %v1488_v38 }
 0xc7b   :  { %2429 = vpow2.f32 %v1893_v3  ;;  %v1890_v41 = vmul.f32 -1.442695, %v1379_v39 }
 0xc7c   :  { %2431 = vpow2.f32 %v1889_v31 }
 0xc7d   :  { %2433 = vtanh.f32 %v1488_v38 }
 0xc7e   :  { %2435 = vtanh.f32 %v1379_v39 }
 0xc85   :  { %v2430_v37 = vpop.eup %2429 }
 0xc86   :  { %v2432_v42 = vpop.eup %2431  ;;  %v1495_v46 = vadd.f32 1.0, %v2430_v37 }
 0xc87   :  { %v1387_v55 = vadd.f32 1.0, %v2432_v42  ;;  %v2434_v22 = vpop.eup %2433 }
 0xc88   :  { %2437 = vrcp.f32 %v1495_v46  ;;  %v2436_v47 = vpop.eup %2435 }
 0xc89   :  { %2439 = vrcp.f32 %v1387_v55 }
 0xc8a   :  { %2441 = vpow2.f32 %v1894_v61 }
 0xc92   :  { %v2438_v48 = vpop.eup %2437 }
 0xc93   :  { %v2440_v54 = vpop.eup %2439  ;;  %v1503_v58 = vmul.f32 %v2438_v48, %v2434_v22  ;;  %v1502_v6 = vmul.f32 %v2438_v48, %v3004_v62 }
 0xc94   :  { %v1395_v30 = vmul.f32 %v2440_v54, %v2436_v47  ;;  %v2442_v63 = vpop.eup %2441  ;;  %v1394_v62 = vmul.f32 %v2440_v54, %v3012_v14 }
 0xc95   :  { %1505 = vrot.lane.b32.xlu1 %v1503_v58, %s2543_s9  ;;  %v1496_v5 = vadd.f32 1.0, %v2442_v63 }
 0xc97   :  { %2443 = vrcp.f32 %v1496_v5 }
 0xc99   :  { %1397 = vrot.lane.b32.xlu1 %v1395_v30, %s2543_s9 }
 0xca1   :  { %v2444_v51 = vpop.eup %2443 }
 0xd07   :  { %v1506_v7 = vpop.permute.xlu1 %1505 }
 0xd08   :  { %v3051_v12 = vadd.f32 %v1506_v7, %v1502_v6 }
 0xd0a   :  { %2445 = vtanh.f32 %v3051_v12 }
 0xd0b   :  { %2447 = vpow2.f32 %v1890_v41  ;;  %v1398_v17 = vpop.permute.xlu1 %1397 }
 0xd0c   :  { %v3059_v4 = vadd.f32 %v1398_v17, %v1394_v62 }
 0xd0e   :  { %2449 = vtanh.f32 %v3059_v4 }
 0xd14   :  { %v2446_v34 = vpop.eup %2445 }
 0xd15   :  { %v1510_v13 = vmul.f32 %v2446_v34, %v2444_v51  ;;  %v2448_v21 = vpop.eup %2447 }
 0xd16   :  { %v1388_v29 = vadd.f32 1.0, %v2448_v21 }
 0xd17   :  { %1512 = vrot.lane.b32.xlu0 %v1510_v13, %s2543_s9 }
 0xd18   :  { %2451 = vrcp.f32 %v1388_v29  ;;  %v2450_v9 = vpop.eup %2449 }
 0xd1b   :  { %1613 = vperm.xlu0 %2295, %v1897_v20  }
 0xd22   :  { %v2452_v10 = vpop.eup %2451 }
 0xd23   :  { %v1402_v15 = vmul.f32 %v2452_v10, %v2450_v9 }
 0xd89   :  { %v1513_v16 = vpop.permute.xlu0 %1512 }
 0xd8a   :  { %v1515_v23 = vsel %vm61_vm0, %v1513_v16, %v1402_v15  ;;  %1898 = vmatmul.mubr.msk.f32.vlgmr.msra.gmra.mrb[12].mxu0 %vm61_vm0, %v1513_v16 }
 0xd8b   :  { %1581 = vmatmul.mubr.f32.vlgmr.msra.gmra.mrb[14].mxu1 %v1515_v23  ;;  %2259 = vmatpush1.bf16.msra.mxu0 %v2703_v1 }
 0xd8c   :  { %2261 = vmatprep.subr.bf16.mxu0 %v2705_v2  ;;  %1786 = vmatprep.mubr.f32.mxu0 %v2541_v0 }
 0xd8f   :  { %2263 = vmatpush1.bf16.msra.mxu0 %v2710_v8 }
 0xd90   :  { %2265 = vmatprep.subr.bf16.mxu0 %v2713_v11 }
 0xd93   :  { %2267 = vmatpush1.bf16.msra.mxu0 %v2716_v18 }
 0xd94   :  { %2269 = vmatprep.subr.bf16.mxu0 %v2719_v19 }
 0xd97   :  { %2271 = vmatpush1.bf16.msra.mxu0 %v2722_v26 }
 0xd98   :  { %2273 = vmatprep.subr.bf16.mxu0 %v2725_v27 }
 0xd9a   :  { %v1614_v0 = vpop.permute.xlu0 %1613 }
 0xd9b   :  { %2275 = vmatpush1.bf16.msra.mxu0 %v2728_v33  ;;  %v1616_v1 = vmul.f32 %v1614_v0, %v2674_v36 }
 0xd9c   :  { %2277 = vmatprep.subr.bf16.mxu0 %v2731_v35 }
 0xd9d   :  { %v1618_v2 = vadd.f32 %v1616_v1, %v2681_v40 }
 0xd9f   :  { %2279 = vmatpush1.bf16.msra.mxu0 %v2734_v43  ;;  %v1617_v43 = vmul.f32 %v1614_v0, %v2687_v44 }
 0xda0   :  { %2281 = vmatprep.subr.bf16.mxu0 %v2737_v45 }
 0xda1   :  { %v1619_v45 = vadd.f32 %v1617_v43, %v2691_v49 }
 0xda3   :  { %2283 = vmatpush1.bf16.msra.mxu0 %v2740_v52 }
 0xda4   :  { %2285 = vmatprep.subr.bf16.mxu0 %v2743_v53 }
 0xda7   :  { %2287 = vmatpush1.bf16.msra.mxu0 %v2746_v57 }
 0xe5d   :  { %v1688_v8 = vpop.f32.mrb[12].mxu0 }
 0xe5e   :  { %v1693_v11 = vadd.f32 %v1688_v8, %v1618_v2  ;;  %v1582_v18 = vpop.f32.mrb[14].mxu1  ;;  %v1690_v19 = vpop.f32.mrb[13].mxu0  ;;  %v1903_v2 = vld [vmem:[%s3118_s6] ss:$0 sm:$0xff] }
 0xe5f   :  { %v1583_v26 = vadd.f32 %v1582_v18, %v2792_v25  ;;  %v1584_v27 = vpop.f32.mrb[15].mxu1  ;;  %v1694_v52 = vadd.f32 %v1690_v19, %v1619_v45 }
 0xe60   :  { %v1899_v33 = vmul.f32 -1.442695, %v1693_v11  ;;  %v1585_v36 = vadd.f32 %v1584_v27, %v2798_v50 }
 0xe61   :  { %v1895_v35 = vmul.f32 -1.442695, %v1583_v26  ;;  %v1900_v49 = vmul.f32 -1.442695, %v1694_v52  ;;  %v1846_v26 = vld [vmem:[%s3119_s7] sm:$0xff] }
 0xe62   :  { %2453 = vpow2.f32 %v1899_v33  ;;  %v1896_v55 = vmul.f32 -1.442695, %v1585_v36 }
 0xe63   :  { %2455 = vpow2.f32 %v1895_v35 }
 0xe64   :  { %2457 = vtanh.f32 %v1694_v52 }
 0xe65   :  { %2459 = vtanh.f32 %v1585_v36 }
 0xe6c   :  { %v2454_v53 = vpop.eup %2453 }
 0xe6d   :  { %v2456_v40 = vpop.eup %2455  ;;  %v1701_v57 = vadd.f32 1.0, %v2454_v53 }
 0xe6e   :  { %v1593_v14 = vadd.f32 1.0, %v2456_v40  ;;  %v2458_v24 = vpop.eup %2457 }
 0xe6f   :  { %2461 = vrcp.f32 %v1701_v57  ;;  %v2460_v28 = vpop.eup %2459 }
 0xe70   :  { %2463 = vrcp.f32 %v1593_v14 }
 0xe71   :  { %2465 = vpow2.f32 %v1900_v49 }
 0xe79   :  { %v2462_v60 = vpop.eup %2461 }
 0xe7a   :  { %v2464_v59 = vpop.eup %2463  ;;  %v1709_v3 = vmul.f32 %v2462_v60, %v2458_v24  ;;  %v1708_v56 = vmul.f32 %v2462_v60, %v3051_v12 }
 0xe7b   :  { %v1601_v44 = vmul.f32 %v2464_v59, %v2460_v28  ;;  %v2466_v31 = vpop.eup %2465  ;;  %v1600_v47 = vmul.f32 %v2464_v59, %v3059_v4 }
 0xe7c   :  { %1711 = vrot.lane.b32.xlu1 %v1709_v3, %s2543_s9  ;;  %v1702_v32 = vadd.f32 1.0, %v2466_v31 }
 0xe7d   :  { %1603 = vrot.lane.b32.xlu0 %v1601_v44, %s2543_s9 }
 0xe7e   :  { %2467 = vrcp.f32 %v1702_v32 }
 0xe88   :  { %v2468_v37 = vpop.eup %2467 }
 0xeee   :  { %v1712_v38 = vpop.permute.xlu1 %1711 }
 0xeef   :  { %v1714_v39 = vadd.f32 %v1712_v38, %v1708_v56  ;;  %v1604_v22 = vpop.permute.xlu0 %1603 }
 0xef0   :  { %v1606_v54 = vadd.f32 %v1604_v22, %v1600_v47 }
 0xef1   :  { %2469 = vtanh.f32 %v1714_v39 }
 0xef2   :  { %2471 = vpow2.f32 %v1896_v55 }
 0xef3   :  { %2473 = vtanh.f32 %v1606_v54 }
 0xefb   :  { %v2470_v42 = vpop.eup %2469 }
 0xefc   :  { %v1716_v46 = vmul.f32 %v2470_v42, %v2468_v37  ;;  %v2472_v48 = vpop.eup %2471 }
 0xefd   :  { %v1594_v58 = vadd.f32 1.0, %v2472_v48  ;;  %v2474_v30 = vpop.eup %2473 }
 0xefe   :  { %1718 = vrot.lane.b32.xlu1 %v1716_v46, %s2543_s9 }
 0xeff   :  { %2475 = vrcp.f32 %v1594_v58 }
 0xf09   :  { %v2476_v61 = vpop.eup %2475 }
 0xf0a   :  { %v1608_v63 = vmul.f32 %v2476_v61, %v2474_v30 }
 0xf70   :  { %v1719_v5 = vpop.permute.xlu1 %1718 }
 0xf71   :  { %v1721_v6 = vsel %vm61_vm0, %v1719_v5, %v1608_v63  ;;  %1815 = vst.msk [vmem:[#allocation2] sm:$0xff] %vm61_vm0, %v1719_v5 }
 0xf72   :  { %1787 = vmatmul.mubr.f32.vlgmr.msra.gmra.mrb[14].mxu0 %v1721_v6 }
0x1045   :  { %v1788_v7 = vpop.f32.mrb[14].mxu0 }
0x1046   :  { %v1789_v12 = vadd.f32 %v1788_v7, %v2792_v25  ;;  %v1790_v51 = vpop.f32.mrb[15].mxu0 }
0x1047   :  { %v1791_v13 = vadd.f32 %v1790_v51, %v2798_v50 }
0x1048   :  { %v1901_v34 = vmul.f32 -1.442695, %v1789_v12 }
0x1049   :  { %v1902_v4 = vmul.f32 -1.442695, %v1791_v13 }
0x104a   :  { %2477 = vpow2.f32 %v1901_v34 }
0x104b   :  { %2479 = vtanh.f32 %v1791_v13 }
0x1054   :  { %v2478_v20 = vpop.eup %2477 }
0x1055   :  { %v1799_v41 = vadd.f32 1.0, %v2478_v20  ;;  %v2480_v17 = vpop.eup %2479 }
0x1057   :  { %2481 = vrcp.f32 %v1799_v41 }
0x1058   :  { %2483 = vpow2.f32 %v1902_v4 }
0x1061   :  { %v2482_v62 = vpop.eup %2481 }
0x1062   :  { %v1807_v21 = vmul.f32 %v2482_v62, %v2480_v17  ;;  %v2484_v29 = vpop.eup %2483  ;;  %v1806_v10 = vmul.f32 %v2482_v62, %v1606_v54 }
0x1063   :  { %v1800_v9 = vadd.f32 1.0, %v2484_v29 }
0x1064   :  { %1809 = vrot.lane.b32.xlu0 %v1807_v21, %s2543_s9 }
0x1065   :  { %2485 = vrcp.f32 %v1800_v9 }
0x106f   :  { %v2486_v16 = vpop.eup %2485 }
0x10d6   :  { %v1810_v25 = vpop.permute.xlu0 %1809 }
0x10d7   :  { %v1812_v15 = vadd.f32 %v1810_v25, %v1806_v10 }
0x10d9   :  { %2487 = vtanh.f32 %v1812_v15 }
0x10e3   :  { %v2488_v50 = vpop.eup %2487 }
0x10e4   :  { %v1814_v23 = vmul.f32 %v2488_v50, %v2486_v16 }
0x10e6   :  { %1822 = vrot.lane.b32.xlu1 %v1814_v23, %s2543_s9 }
0x10ea   :  { %1817 = vrot.lane.b32.xlu1 %v1714_v39, %s2543_s9 }
0x10ee   :  { %1827 = vrot.lane.b32.xlu1 %v1812_v15, %s2543_s9 }
0x1158   :  { %v1823_v0 = vpop.permute.xlu1 %1822 }
0x1159   :  { %1825 = vst.msk [vmem:[#allocation4] sm:$0xff] %vm61_vm0, %v1823_v0 }
0x115c   :  { %v1818_v1 = vpop.permute.xlu1 %1817 }
0x115d   :  { %1820 = vst.msk [vmem:[#allocation3] sm:$0xff] %vm61_vm0, %v1818_v1 }
0x1160   :  { %v1828_v8 = vpop.permute.xlu1 %1827  ;;  %v1834_v11 = vld [vmem:[#allocation4] sm:$0xff] }
0x1161   :  { %1830 = vst.msk [vmem:[#allocation5] sm:$0xff] %vm61_vm0, %v1828_v8  ;;  %v1842_v18 = vmul.f32 %v1903_v2, %v1834_v11 }
0x1163   :  { %v1843_v19 = vsel %vm61_vm0, %v1842_v18, 0.0 }
0x1164   :  { %1844 = vadd.xlane.f32.xlu0 %v1843_v19 }
0x11f1   :  { %v1845_v27 = vpop.xlane.xlu0 %1844 }
0x11f2   :  { %v1847_v33 = vadd.f32 %v1846_v26, %v1845_v27 }
0x11f4   :  { %1849 = vst.msk [vmem:[%s3120_s8] sm:$0xff] %vm1848_vm1, %v1847_v33 }
0x11f5   :  { %1854 = vsyncpa [#allocation7], 1 }
0x11f6   :  { %1855 = vsyncpa [#allocation9], 1 }

</bundles_post_ra>
